<compile_context>
chip_gen: v7x
topology: tpu7x:2x2x1
jax: 0.10.0
libtpu: 0.0.40
codegen_flags: <defaults>
</compile_context>

<pallas_src>
import jax
import jax.numpy as jnp
from jax.experimental import pallas as pl
from jax.experimental.pallas import tpu as pltpu

D_MODEL = 256
HEADS = 8
HEAD_DIM = D_MODEL // HEADS        # 32
SCALE = 64 ** (-0.5)               # module default dim_head=64
LN_EPS = 1e-5                      # nn.LayerNorm default eps


# ------------------------------ fused kernel --------------------------------

def _prenorm_attn_kernel(x_ref, c1_ref, g_ref, bta_ref,
                         wq_ref, wk_ref, wv_ref, wo_ref, bo_ref, o_ref):
    """One batch element per grid step; everything fused, weights resident in VMEM.

    Shapes (per grid step):
      x_ref  : (N2, 256)  key/value source (gets LayerNorm)
      c1_ref : (N1, 256)  query source (passes through un-normalized, per PreNorm)
      g_ref, bta_ref, bo_ref : (1, 256)
      wq_ref, wk_ref, wv_ref : (H, Dh, 256) bf16   (PyTorch (out,in) rows split per head)
      wo_ref                 : (H, Dh, 256) bf16   (= Wo.T split per head along the in dim)
      o_ref  : (N1, 256)
    """
    # ---- PreNorm: LayerNorm over the feature dim (f32 math) -----------------
    x = x_ref[...]                                              # (N2, D) f32
    mean = jnp.mean(x, axis=-1, keepdims=True)
    xc = x - mean
    var = jnp.mean(xc * xc, axis=-1, keepdims=True)
    xn = xc * jax.lax.rsqrt(var + LN_EPS)
    xn = xn * g_ref[...] + bta_ref[...]                         # (N2, D)

    # bf16 MXU operands, f32 accumulation everywhere below.
    c1b = c1_ref[...].astype(jnp.bfloat16)                      # (N1, D)
    xnb = xn.astype(jnp.bfloat16)                               # (N2, D)

    n1 = c1_ref.shape[0]
    acc = jnp.zeros((n1, D_MODEL), jnp.float32)                 # output accumulator

    contract_last = (((1,), (1,)), ((), ()))                    # contract dim1 . dim1

    # ---- fn: multi-head cross-attention (all heads inside this one kernel) --
    for h in range(HEADS):
        # Projections against (out, in)-oriented per-head weights (no transposes).
        qh = jax.lax.dot_general(c1b, wq_ref[h], contract_last,
                                 preferred_element_type=jnp.float32)      # (N1, Dh)
        kh = jax.lax.dot_general(xnb, wk_ref[h], contract_last,
                                 preferred_element_type=jnp.float32)      # (N2, Dh)
        vh = jax.lax.dot_general(xnb, wv_ref[h], contract_last,
                                 preferred_element_type=jnp.float32)      # (N2, Dh)

        # Scaled dot-product attention, softmax in f32.
        s = jax.lax.dot_general(qh.astype(jnp.bfloat16), kh.astype(jnp.bfloat16),
                                contract_last,
                                preferred_element_type=jnp.float32) * SCALE  # (N1, N2)
        s = s - jnp.max(s, axis=-1, keepdims=True)
        p = jnp.exp(s)
        p = p * pl.reciprocal(jnp.sum(p, axis=-1, keepdims=True), approx=True)

        oh = jnp.dot(p.astype(jnp.bfloat16), vh.astype(jnp.bfloat16),
                     preferred_element_type=jnp.float32)                  # (N1, Dh)

        # Fold head output straight into the output projection:
        #   out += oh @ Wo.T[h*Dh:(h+1)*Dh, :]   (keeps the store lane-dense)
        acc = acc + jnp.dot(oh.astype(jnp.bfloat16), wo_ref[h],
                            preferred_element_type=jnp.float32)           # (N1, D)

    # to_out bias folded into the single lane-dense (N1, 256) store.
    o_ref[...] = acc + bo_ref[...]


# ------------------------------ wrappers -------------------------------------

def prepare_params(raw):
    """Rearrange PyTorch-layout params once (outside jit): per-head, bf16, lane-dense."""
    wq = jnp.asarray(raw["wq"])          # (out, in) = (256, 256)
    wk = jnp.asarray(raw["wk"])
    wv = jnp.asarray(raw["wv"])
    wo = jnp.asarray(raw["wo"])
    return {
        # rows of the (out, in) weight split per head: (H, Dh, 256)
        "wq": wq.reshape(HEADS, HEAD_DIM, D_MODEL).astype(jnp.bfloat16),
        "wk": wk.reshape(HEADS, HEAD_DIM, D_MODEL).astype(jnp.bfloat16),
        "wv": wv.reshape(HEADS, HEAD_DIM, D_MODEL).astype(jnp.bfloat16),
        # Wo.T (in, out) split along the in dim per head: (H, Dh, 256)
        "wo": wo.T.reshape(HEADS, HEAD_DIM, D_MODEL).astype(jnp.bfloat16),
        "bo": jnp.asarray(raw["bo"]).reshape(1, D_MODEL).astype(jnp.float32),
        "gamma": jnp.asarray(raw["gamma"]).reshape(1, D_MODEL).astype(jnp.float32),
        "beta": jnp.asarray(raw["beta"]).reshape(1, D_MODEL).astype(jnp.float32),
    }


def prenorm_forward(x, c1, params):
    """PreNorm(LayerNorm(256), Attention_global5).forward(x, c1=c1)."""
    B, N2, _ = x.shape
    N1 = c1.shape[1]
    return pl.pallas_call(
        _prenorm_attn_kernel,
        out_shape=jax.ShapeDtypeStruct((B, N1, D_MODEL), jnp.float32),
        grid=(B,),
        in_specs=[
            pl.BlockSpec((None, N2, D_MODEL), lambda b: (b, 0, 0)),        # x  (kv src)
            pl.BlockSpec((None, N1, D_MODEL), lambda b: (b, 0, 0)),        # c1 (queries)
            pl.BlockSpec((1, D_MODEL), lambda b: (0, 0)),                  # gamma
            pl.BlockSpec((1, D_MODEL), lambda b: (0, 0)),                  # beta
            pl.BlockSpec((HEADS, HEAD_DIM, D_MODEL), lambda b: (0, 0, 0)),  # wq
            pl.BlockSpec((HEADS, HEAD_DIM, D_MODEL), lambda b: (0, 0, 0)),  # wk
            pl.BlockSpec((HEADS, HEAD_DIM, D_MODEL), lambda b: (0, 0, 0)),  # wv
            pl.BlockSpec((HEADS, HEAD_DIM, D_MODEL), lambda b: (0, 0, 0)),  # wo
            pl.BlockSpec((1, D_MODEL), lambda b: (0, 0)),                  # bo
        ],
        out_specs=pl.BlockSpec((None, N1, D_MODEL), lambda b: (b, 0, 0)),
        compiler_params=pltpu.CompilerParams(
            dimension_semantics=("parallel",)),
    )(x, c1, params["gamma"], params["beta"],
      params["wq"], params["wk"], params["wv"], params["wo"], params["bo"])


def reference_forward(x, c1, raw):
    """Pure-JAX reference: LayerNorm(x) then Attention_global5-style cross attention."""
    hp = jax.lax.Precision.HIGHEST
    B, N1, _ = c1.shape
    N2 = x.shape[1]
    mean = jnp.mean(x, axis=-1, keepdims=True)
    var = jnp.mean((x - mean) ** 2, axis=-1, keepdims=True)
    xn = (x - mean) / jnp.sqrt(var + LN_EPS) * raw["gamma"] + raw["beta"]
    q = jnp.einsum("bnk,ok->bno", c1, raw["wq"], precision=hp)
    k = jnp.einsum("bnk,ok->bno", xn, raw["wk"], precision=hp)
    v = jnp.einsum("bnk,ok->bno", xn, raw["wv"], precision=hp)
    q = q.reshape(B, N1, HEADS, HEAD_DIM).transpose(0, 2, 1, 3)
    k = k.reshape(B, N2, HEADS, HEAD_DIM).transpose(0, 2, 1, 3)
    v = v.reshape(B, N2, HEADS, HEAD_DIM).transpose(0, 2, 1, 3)
    s = jnp.einsum("bhnd,bhmd->bhnm", q, k, precision=hp) * SCALE
    a = jax.nn.softmax(s, axis=-1)
    o = jnp.einsum("bhnm,bhmd->bhnd", a, v, precision=hp)
    o = o.transpose(0, 2, 1, 3).reshape(B, N1, D_MODEL)
    return jnp.einsum("bnk,ok->bno", o, raw["wo"], precision=hp) + raw["bo"]


# --------------------------------- main --------------------------------------

if __name__ == "__main__":
    key = jax.random.PRNGKey(0)
    keys = jax.random.split(key, 9)

    B, N1, N2 = 2, 16, 8
    x = jax.random.normal(keys[0], (B, N2, D_MODEL), jnp.float32)   # PreNorm input (kv source)
    c1 = jax.random.normal(keys[1], (B, N1, D_MODEL), jnp.float32)  # query source (kwarg)

    # Deterministic synthetic parameters (PyTorch layout: weight (out, in), bias (out,))
    raw = {
        "wq": 0.02 * jax.random.normal(keys[2], (D_MODEL, D_MODEL), jnp.float32),
        "wk": 0.02 * jax.random.normal(keys[3], (D_MODEL, D_MODEL), jnp.float32),
        "wv": 0.02 * jax.random.normal(keys[4], (D_MODEL, D_MODEL), jnp.float32),
        "wo": 0.02 * jax.random.normal(keys[5], (D_MODEL, D_MODEL), jnp.float32),
        "bo": 0.01 * jax.random.normal(keys[6], (D_MODEL,), jnp.float32),
        "gamma": 1.0 + 0.1 * jax.random.normal(keys[7], (D_MODEL,), jnp.float32),
        "beta": 0.05 * jax.random.normal(keys[8], (D_MODEL,), jnp.float32),
    }
    params = prepare_params(raw)      # one-time weight rearrangement, outside jit

    fwd = jax.jit(prenorm_forward)
    out = jax.block_until_ready(fwd(x, c1, params))

    ref = jax.block_until_ready(reference_forward(x, c1, raw))
    assert out.shape == (B, N1, D_MODEL), out.shape
    max_err = float(jnp.max(jnp.abs(out - ref)))
    assert jnp.allclose(out, ref, atol=2e-2, rtol=2e-2), max_err

    print("KERNEL_OK")
</pallas_src>

<mosaic_0001>
module attributes {stable_mosaic.version = 11 : i64} {
  func.func @_prenorm_attn_kernel(%arg0: i32, %arg1: memref<1x8x256xf32, #tpu.memory_space<vmem>>, %arg2: memref<1x16x256xf32, #tpu.memory_space<vmem>>, %arg3: memref<1x256xf32, #tpu.memory_space<vmem>>, %arg4: memref<1x256xf32, #tpu.memory_space<vmem>>, %arg5: memref<8x32x256xbf16, #tpu.memory_space<vmem>>, %arg6: memref<8x32x256xbf16, #tpu.memory_space<vmem>>, %arg7: memref<8x32x256xbf16, #tpu.memory_space<vmem>>, %arg8: memref<8x32x256xbf16, #tpu.memory_space<vmem>>, %arg9: memref<1x256xf32, #tpu.memory_space<vmem>>, %arg10: memref<1x16x256xf32, #tpu.memory_space<vmem>>) attributes {dimension_semantics = [#tpu.dimension_semantics<parallel>], iteration_bounds = array<i64: 2>, scalar_prefetch = 0 : i64, scratch_operands = 0 : i64, tpu.core_type = #tpu.core_type<tc>, window_params = [{transform_indices = @transform_0, window_bounds = array<i64: 1, 8, 256>}, {transform_indices = @transform_1, window_bounds = array<i64: 1, 16, 256>}, {pipeline_mode = #tpu.pipeline_mode<synchronous>, transform_indices = @transform_2, window_bounds = array<i64: 1, 256>}, {pipeline_mode = #tpu.pipeline_mode<synchronous>, transform_indices = @transform_3, window_bounds = array<i64: 1, 256>}, {pipeline_mode = #tpu.pipeline_mode<synchronous>, transform_indices = @transform_4, window_bounds = array<i64: 8, 32, 256>}, {pipeline_mode = #tpu.pipeline_mode<synchronous>, transform_indices = @transform_5, window_bounds = array<i64: 8, 32, 256>}, {pipeline_mode = #tpu.pipeline_mode<synchronous>, transform_indices = @transform_6, window_bounds = array<i64: 8, 32, 256>}, {pipeline_mode = #tpu.pipeline_mode<synchronous>, transform_indices = @transform_7, window_bounds = array<i64: 8, 32, 256>}, {pipeline_mode = #tpu.pipeline_mode<synchronous>, transform_indices = @transform_8, window_bounds = array<i64: 1, 256>}, {transform_indices = @transform_9, window_bounds = array<i64: 1, 16, 256>}]} {
    %c0 = arith.constant 0 : index
    %c0_0 = arith.constant 0 : index
    %c0_1 = arith.constant 0 : index
    %0 = vector.load %arg1[%c0, %c0_0, %c0_1] : memref<1x8x256xf32, #tpu.memory_space<vmem>>, vector<1x8x256xf32>
    %1 = vector.shape_cast %0 : vector<1x8x256xf32> to vector<8x256xf32>
    %cst = arith.constant dense<0.000000e+00> : vector<8xf32>
    %2 = vector.multi_reduction <add>, %1, %cst [1] : vector<8x256xf32> to vector<8xf32>
    %3 = vector.shape_cast %2 : vector<8xf32> to vector<8x1xf32>
    %cst_2 = arith.constant 2.560000e+02 : f32
    %4 = vector.broadcast %cst_2 : f32 to vector<8x1xf32>
    %5 = arith.divf %3, %4 : vector<8x1xf32>
    %6 = vector.broadcast %5 : vector<8x1xf32> to vector<8x256xf32>
    %7 = arith.subf %1, %6 : vector<8x256xf32>
    %8 = arith.mulf %7, %7 : vector<8x256xf32>
    %cst_3 = arith.constant dense<0.000000e+00> : vector<8xf32>
    %9 = vector.multi_reduction <add>, %8, %cst_3 [1] : vector<8x256xf32> to vector<8xf32>
    %10 = vector.shape_cast %9 : vector<8xf32> to vector<8x1xf32>
    %cst_4 = arith.constant 2.560000e+02 : f32
    %11 = vector.broadcast %cst_4 : f32 to vector<8x1xf32>
    %12 = arith.divf %10, %11 : vector<8x1xf32>
    %cst_5 = arith.constant 9.99999974E-6 : f32
    %13 = vector.broadcast %cst_5 : f32 to vector<8x1xf32>
    %14 = arith.addf %12, %13 : vector<8x1xf32>
    %15 = math.rsqrt %14 : vector<8x1xf32>
    %16 = vector.broadcast %15 : vector<8x1xf32> to vector<8x256xf32>
    %17 = arith.mulf %7, %16 : vector<8x256xf32>
    %c0_6 = arith.constant 0 : index
    %c0_7 = arith.constant 0 : index
    %18 = vector.load %arg3[%c0_6, %c0_7] : memref<1x256xf32, #tpu.memory_space<vmem>>, vector<1x256xf32>
    %19 = vector.broadcast %18 : vector<1x256xf32> to vector<8x256xf32>
    %20 = arith.mulf %17, %19 : vector<8x256xf32>
    %c0_8 = arith.constant 0 : index
    %c0_9 = arith.constant 0 : index
    %21 = vector.load %arg4[%c0_8, %c0_9] : memref<1x256xf32, #tpu.memory_space<vmem>>, vector<1x256xf32>
    %22 = vector.broadcast %21 : vector<1x256xf32> to vector<8x256xf32>
    %23 = arith.addf %20, %22 : vector<8x256xf32>
    %c0_10 = arith.constant 0 : index
    %c0_11 = arith.constant 0 : index
    %c0_12 = arith.constant 0 : index
    %24 = vector.load %arg2[%c0_10, %c0_11, %c0_12] : memref<1x16x256xf32, #tpu.memory_space<vmem>>, vector<1x16x256xf32>
    %25 = vector.shape_cast %24 : vector<1x16x256xf32> to vector<16x256xf32>
    %26 = arith.truncf %25 : vector<16x256xf32> to vector<16x256xbf16>
    %27 = arith.truncf %23 : vector<8x256xf32> to vector<8x256xbf16>
    %cst_13 = arith.constant 0.000000e+00 : f32
    %28 = vector.broadcast %cst_13 : f32 to vector<16x256xf32>
    %c0_14 = arith.constant 0 : index
    %c0_15 = arith.constant 0 : index
    %c0_16 = arith.constant 0 : index
    %29 = vector.load %arg5[%c0_14, %c0_15, %c0_16] : memref<8x32x256xbf16, #tpu.memory_space<vmem>>, vector<1x32x256xbf16>
    %30 = vector.shape_cast %29 : vector<1x32x256xbf16> to vector<32x256xbf16>
    %cst_17 = arith.constant dense<0.000000e+00> : vector<16x32xf32>
    %31 = tpu.matmul %26, %30, %cst_17 {dimension_numbers = #tpu.dot_dimension_numbers<[1], [1], [0], [0], [0, 0, 1, 0], [], []>} : vector<16x256xbf16>, vector<32x256xbf16>, vector<16x32xf32> -> vector<16x32xf32>
    %c0_18 = arith.constant 0 : index
    %c0_19 = arith.constant 0 : index
    %c0_20 = arith.constant 0 : index
    %32 = vector.load %arg6[%c0_18, %c0_19, %c0_20] : memref<8x32x256xbf16, #tpu.memory_space<vmem>>, vector<1x32x256xbf16>
    %33 = vector.shape_cast %32 : vector<1x32x256xbf16> to vector<32x256xbf16>
    %cst_21 = arith.constant dense<0.000000e+00> : vector<8x32xf32>
    %34 = tpu.matmul %27, %33, %cst_21 {dimension_numbers = #tpu.dot_dimension_numbers<[1], [1], [0], [0], [0, 0, 1, 0], [], []>} : vector<8x256xbf16>, vector<32x256xbf16>, vector<8x32xf32> -> vector<8x32xf32>
    %c0_22 = arith.constant 0 : index
    %c0_23 = arith.constant 0 : index
    %c0_24 = arith.constant 0 : index
    %35 = vector.load %arg7[%c0_22, %c0_23, %c0_24] : memref<8x32x256xbf16, #tpu.memory_space<vmem>>, vector<1x32x256xbf16>
    %36 = vector.shape_cast %35 : vector<1x32x256xbf16> to vector<32x256xbf16>
    %cst_25 = arith.constant dense<0.000000e+00> : vector<8x32xf32>
    %37 = tpu.matmul %27, %36, %cst_25 {dimension_numbers = #tpu.dot_dimension_numbers<[1], [1], [0], [0], [0, 0, 1, 0], [], []>} : vector<8x256xbf16>, vector<32x256xbf16>, vector<8x32xf32> -> vector<8x32xf32>
    %38 = arith.truncf %31 : vector<16x32xf32> to vector<16x32xbf16>
    %39 = arith.truncf %34 : vector<8x32xf32> to vector<8x32xbf16>
    %cst_26 = arith.constant dense<0.000000e+00> : vector<16x8xf32>
    %40 = tpu.matmul %38, %39, %cst_26 {dimension_numbers = #tpu.dot_dimension_numbers<[1], [1], [0], [0], [0, 0, 1, 0], [], []>} : vector<16x32xbf16>, vector<8x32xbf16>, vector<16x8xf32> -> vector<16x8xf32>
    %cst_27 = arith.constant 1.250000e-01 : f32
    %41 = vector.broadcast %cst_27 : f32 to vector<16x8xf32>
    %42 = arith.mulf %40, %41 : vector<16x8xf32>
    %cst_28 = arith.constant dense<0xFF800000> : vector<16xf32>
    %43 = vector.multi_reduction <maximumf>, %42, %cst_28 [1] : vector<16x8xf32> to vector<16xf32>
    %44 = vector.shape_cast %43 : vector<16xf32> to vector<16x1xf32>
    %45 = vector.broadcast %44 : vector<16x1xf32> to vector<16x8xf32>
    %46 = arith.subf %42, %45 : vector<16x8xf32>
    %47 = math.exp %46 : vector<16x8xf32>
    %cst_29 = arith.constant dense<0.000000e+00> : vector<16xf32>
    %48 = vector.multi_reduction <add>, %47, %cst_29 [1] : vector<16x8xf32> to vector<16xf32>
    %49 = vector.shape_cast %48 : vector<16xf32> to vector<16x1xf32>
    %50 = tpu.reciprocal %49 {approx = true} : vector<16x1xf32> -> vector<16x1xf32>
    %51 = vector.broadcast %50 : vector<16x1xf32> to vector<16x8xf32>
    %52 = arith.mulf %47, %51 : vector<16x8xf32>
    %53 = arith.truncf %52 : vector<16x8xf32> to vector<16x8xbf16>
    %54 = arith.truncf %37 : vector<8x32xf32> to vector<8x32xbf16>
    %cst_30 = arith.constant dense<0.000000e+00> : vector<16x32xf32>
    %55 = tpu.matmul %53, %54, %cst_30 {dimension_numbers = #tpu.dot_dimension_numbers<[1], [0], [0], [1], [0, 0, 1, 1], [], []>} : vector<16x8xbf16>, vector<8x32xbf16>, vector<16x32xf32> -> vector<16x32xf32>
    %56 = arith.truncf %55 : vector<16x32xf32> to vector<16x32xbf16>
    %c0_31 = arith.constant 0 : index
    %c0_32 = arith.constant 0 : index
    %c0_33 = arith.constant 0 : index
    %57 = vector.load %arg8[%c0_31, %c0_32, %c0_33] : memref<8x32x256xbf16, #tpu.memory_space<vmem>>, vector<1x32x256xbf16>
    %58 = vector.shape_cast %57 : vector<1x32x256xbf16> to vector<32x256xbf16>
    %cst_34 = arith.constant dense<0.000000e+00> : vector<16x256xf32>
    %59 = tpu.matmul %56, %58, %cst_34 {dimension_numbers = #tpu.dot_dimension_numbers<[1], [0], [0], [1], [0, 0, 1, 1], [], []>} : vector<16x32xbf16>, vector<32x256xbf16>, vector<16x256xf32> -> vector<16x256xf32>
    %60 = arith.addf %28, %59 : vector<16x256xf32>
    %c1 = arith.constant 1 : index
    %c0_35 = arith.constant 0 : index
    %c0_36 = arith.constant 0 : index
    %61 = vector.load %arg5[%c1, %c0_35, %c0_36] : memref<8x32x256xbf16, #tpu.memory_space<vmem>>, vector<1x32x256xbf16>
    %62 = vector.shape_cast %61 : vector<1x32x256xbf16> to vector<32x256xbf16>
    %cst_37 = arith.constant dense<0.000000e+00> : vector<16x32xf32>
    %63 = tpu.matmul %26, %62, %cst_37 {dimension_numbers = #tpu.dot_dimension_numbers<[1], [1], [0], [0], [0, 0, 1, 0], [], []>} : vector<16x256xbf16>, vector<32x256xbf16>, vector<16x32xf32> -> vector<16x32xf32>
    %c1_38 = arith.constant 1 : index
    %c0_39 = arith.constant 0 : index
    %c0_40 = arith.constant 0 : index
    %64 = vector.load %arg6[%c1_38, %c0_39, %c0_40] : memref<8x32x256xbf16, #tpu.memory_space<vmem>>, vector<1x32x256xbf16>
    %65 = vector.shape_cast %64 : vector<1x32x256xbf16> to vector<32x256xbf16>
    %cst_41 = arith.constant dense<0.000000e+00> : vector<8x32xf32>
    %66 = tpu.matmul %27, %65, %cst_41 {dimension_numbers = #tpu.dot_dimension_numbers<[1], [1], [0], [0], [0, 0, 1, 0], [], []>} : vector<8x256xbf16>, vector<32x256xbf16>, vector<8x32xf32> -> vector<8x32xf32>
    %c1_42 = arith.constant 1 : index
    %c0_43 = arith.constant 0 : index
    %c0_44 = arith.constant 0 : index
    %67 = vector.load %arg7[%c1_42, %c0_43, %c0_44] : memref<8x32x256xbf16, #tpu.memory_space<vmem>>, vector<1x32x256xbf16>
    %68 = vector.shape_cast %67 : vector<1x32x256xbf16> to vector<32x256xbf16>
    %cst_45 = arith.constant dense<0.000000e+00> : vector<8x32xf32>
    %69 = tpu.matmul %27, %68, %cst_45 {dimension_numbers = #tpu.dot_dimension_numbers<[1], [1], [0], [0], [0, 0, 1, 0], [], []>} : vector<8x256xbf16>, vector<32x256xbf16>, vector<8x32xf32> -> vector<8x32xf32>
    %70 = arith.truncf %63 : vector<16x32xf32> to vector<16x32xbf16>
    %71 = arith.truncf %66 : vector<8x32xf32> to vector<8x32xbf16>
    %cst_46 = arith.constant dense<0.000000e+00> : vector<16x8xf32>
    %72 = tpu.matmul %70, %71, %cst_46 {dimension_numbers = #tpu.dot_dimension_numbers<[1], [1], [0], [0], [0, 0, 1, 0], [], []>} : vector<16x32xbf16>, vector<8x32xbf16>, vector<16x8xf32> -> vector<16x8xf32>
    %cst_47 = arith.constant 1.250000e-01 : f32
    %73 = vector.broadcast %cst_47 : f32 to vector<16x8xf32>
    %74 = arith.mulf %72, %73 : vector<16x8xf32>
    %cst_48 = arith.constant dense<0xFF800000> : vector<16xf32>
    %75 = vector.multi_reduction <maximumf>, %74, %cst_48 [1] : vector<16x8xf32> to vector<16xf32>
    %76 = vector.shape_cast %75 : vector<16xf32> to vector<16x1xf32>
    %77 = vector.broadcast %76 : vector<16x1xf32> to vector<16x8xf32>
    %78 = arith.subf %74, %77 : vector<16x8xf32>
    %79 = math.exp %78 : vector<16x8xf32>
    %cst_49 = arith.constant dense<0.000000e+00> : vector<16xf32>
    %80 = vector.multi_reduction <add>, %79, %cst_49 [1] : vector<16x8xf32> to vector<16xf32>
    %81 = vector.shape_cast %80 : vector<16xf32> to vector<16x1xf32>
    %82 = tpu.reciprocal %81 {approx = true} : vector<16x1xf32> -> vector<16x1xf32>
    %83 = vector.broadcast %82 : vector<16x1xf32> to vector<16x8xf32>
    %84 = arith.mulf %79, %83 : vector<16x8xf32>
    %85 = arith.truncf %84 : vector<16x8xf32> to vector<16x8xbf16>
    %86 = arith.truncf %69 : vector<8x32xf32> to vector<8x32xbf16>
    %cst_50 = arith.constant dense<0.000000e+00> : vector<16x32xf32>
    %87 = tpu.matmul %85, %86, %cst_50 {dimension_numbers = #tpu.dot_dimension_numbers<[1], [0], [0], [1], [0, 0, 1, 1], [], []>} : vector<16x8xbf16>, vector<8x32xbf16>, vector<16x32xf32> -> vector<16x32xf32>
    %88 = arith.truncf %87 : vector<16x32xf32> to vector<16x32xbf16>
    %c1_51 = arith.constant 1 : index
    %c0_52 = arith.constant 0 : index
    %c0_53 = arith.constant 0 : index
    %89 = vector.load %arg8[%c1_51, %c0_52, %c0_53] : memref<8x32x256xbf16, #tpu.memory_space<vmem>>, vector<1x32x256xbf16>
    %90 = vector.shape_cast %89 : vector<1x32x256xbf16> to vector<32x256xbf16>
    %cst_54 = arith.constant dense<0.000000e+00> : vector<16x256xf32>
    %91 = tpu.matmul %88, %90, %cst_54 {dimension_numbers = #tpu.dot_dimension_numbers<[1], [0], [0], [1], [0, 0, 1, 1], [], []>} : vector<16x32xbf16>, vector<32x256xbf16>, vector<16x256xf32> -> vector<16x256xf32>
    %92 = arith.addf %60, %91 : vector<16x256xf32>
    %c2 = arith.constant 2 : index
    %c0_55 = arith.constant 0 : index
    %c0_56 = arith.constant 0 : index
    %93 = vector.load %arg5[%c2, %c0_55, %c0_56] : memref<8x32x256xbf16, #tpu.memory_space<vmem>>, vector<1x32x256xbf16>
    %94 = vector.shape_cast %93 : vector<1x32x256xbf16> to vector<32x256xbf16>
    %cst_57 = arith.constant dense<0.000000e+00> : vector<16x32xf32>
    %95 = tpu.matmul %26, %94, %cst_57 {dimension_numbers = #tpu.dot_dimension_numbers<[1], [1], [0], [0], [0, 0, 1, 0], [], []>} : vector<16x256xbf16>, vector<32x256xbf16>, vector<16x32xf32> -> vector<16x32xf32>
    %c2_58 = arith.constant 2 : index
    %c0_59 = arith.constant 0 : index
    %c0_60 = arith.constant 0 : index
    %96 = vector.load %arg6[%c2_58, %c0_59, %c0_60] : memref<8x32x256xbf16, #tpu.memory_space<vmem>>, vector<1x32x256xbf16>
    %97 = vector.shape_cast %96 : vector<1x32x256xbf16> to vector<32x256xbf16>
    %cst_61 = arith.constant dense<0.000000e+00> : vector<8x32xf32>
    %98 = tpu.matmul %27, %97, %cst_61 {dimension_numbers = #tpu.dot_dimension_numbers<[1], [1], [0], [0], [0, 0, 1, 0], [], []>} : vector<8x256xbf16>, vector<32x256xbf16>, vector<8x32xf32> -> vector<8x32xf32>
    %c2_62 = arith.constant 2 : index
    %c0_63 = arith.constant 0 : index
    %c0_64 = arith.constant 0 : index
    %99 = vector.load %arg7[%c2_62, %c0_63, %c0_64] : memref<8x32x256xbf16, #tpu.memory_space<vmem>>, vector<1x32x256xbf16>
    %100 = vector.shape_cast %99 : vector<1x32x256xbf16> to vector<32x256xbf16>
    %cst_65 = arith.constant dense<0.000000e+00> : vector<8x32xf32>
    %101 = tpu.matmul %27, %100, %cst_65 {dimension_numbers = #tpu.dot_dimension_numbers<[1], [1], [0], [0], [0, 0, 1, 0], [], []>} : vector<8x256xbf16>, vector<32x256xbf16>, vector<8x32xf32> -> vector<8x32xf32>
    %102 = arith.truncf %95 : vector<16x32xf32> to vector<16x32xbf16>
    %103 = arith.truncf %98 : vector<8x32xf32> to vector<8x32xbf16>
    %cst_66 = arith.constant dense<0.000000e+00> : vector<16x8xf32>
    %104 = tpu.matmul %102, %103, %cst_66 {dimension_numbers = #tpu.dot_dimension_numbers<[1], [1], [0], [0], [0, 0, 1, 0], [], []>} : vector<16x32xbf16>, vector<8x32xbf16>, vector<16x8xf32> -> vector<16x8xf32>
    %cst_67 = arith.constant 1.250000e-01 : f32
    %105 = vector.broadcast %cst_67 : f32 to vector<16x8xf32>
    %106 = arith.mulf %104, %105 : vector<16x8xf32>
    %cst_68 = arith.constant dense<0xFF800000> : vector<16xf32>
    %107 = vector.multi_reduction <maximumf>, %106, %cst_68 [1] : vector<16x8xf32> to vector<16xf32>
    %108 = vector.shape_cast %107 : vector<16xf32> to vector<16x1xf32>
    %109 = vector.broadcast %108 : vector<16x1xf32> to vector<16x8xf32>
    %110 = arith.subf %106, %109 : vector<16x8xf32>
    %111 = math.exp %110 : vector<16x8xf32>
    %cst_69 = arith.constant dense<0.000000e+00> : vector<16xf32>
    %112 = vector.multi_reduction <add>, %111, %cst_69 [1] : vector<16x8xf32> to vector<16xf32>
    %113 = vector.shape_cast %112 : vector<16xf32> to vector<16x1xf32>
    %114 = tpu.reciprocal %113 {approx = true} : vector<16x1xf32> -> vector<16x1xf32>
    %115 = vector.broadcast %114 : vector<16x1xf32> to vector<16x8xf32>
    %116 = arith.mulf %111, %115 : vector<16x8xf32>
    %117 = arith.truncf %116 : vector<16x8xf32> to vector<16x8xbf16>
    %118 = arith.truncf %101 : vector<8x32xf32> to vector<8x32xbf16>
    %cst_70 = arith.constant dense<0.000000e+00> : vector<16x32xf32>
    %119 = tpu.matmul %117, %118, %cst_70 {dimension_numbers = #tpu.dot_dimension_numbers<[1], [0], [0], [1], [0, 0, 1, 1], [], []>} : vector<16x8xbf16>, vector<8x32xbf16>, vector<16x32xf32> -> vector<16x32xf32>
    %120 = arith.truncf %119 : vector<16x32xf32> to vector<16x32xbf16>
    %c2_71 = arith.constant 2 : index
    %c0_72 = arith.constant 0 : index
    %c0_73 = arith.constant 0 : index
    %121 = vector.load %arg8[%c2_71, %c0_72, %c0_73] : memref<8x32x256xbf16, #tpu.memory_space<vmem>>, vector<1x32x256xbf16>
    %122 = vector.shape_cast %121 : vector<1x32x256xbf16> to vector<32x256xbf16>
    %cst_74 = arith.constant dense<0.000000e+00> : vector<16x256xf32>
    %123 = tpu.matmul %120, %122, %cst_74 {dimension_numbers = #tpu.dot_dimension_numbers<[1], [0], [0], [1], [0, 0, 1, 1], [], []>} : vector<16x32xbf16>, vector<32x256xbf16>, vector<16x256xf32> -> vector<16x256xf32>
    %124 = arith.addf %92, %123 : vector<16x256xf32>
    %c3 = arith.constant 3 : index
    %c0_75 = arith.constant 0 : index
    %c0_76 = arith.constant 0 : index
    %125 = vector.load %arg5[%c3, %c0_75, %c0_76] : memref<8x32x256xbf16, #tpu.memory_space<vmem>>, vector<1x32x256xbf16>
    %126 = vector.shape_cast %125 : vector<1x32x256xbf16> to vector<32x256xbf16>
    %cst_77 = arith.constant dense<0.000000e+00> : vector<16x32xf32>
    %127 = tpu.matmul %26, %126, %cst_77 {dimension_numbers = #tpu.dot_dimension_numbers<[1], [1], [0], [0], [0, 0, 1, 0], [], []>} : vector<16x256xbf16>, vector<32x256xbf16>, vector<16x32xf32> -> vector<16x32xf32>
    %c3_78 = arith.constant 3 : index
    %c0_79 = arith.constant 0 : index
    %c0_80 = arith.constant 0 : index
    %128 = vector.load %arg6[%c3_78, %c0_79, %c0_80] : memref<8x32x256xbf16, #tpu.memory_space<vmem>>, vector<1x32x256xbf16>
    %129 = vector.shape_cast %128 : vector<1x32x256xbf16> to vector<32x256xbf16>
    %cst_81 = arith.constant dense<0.000000e+00> : vector<8x32xf32>
    %130 = tpu.matmul %27, %129, %cst_81 {dimension_numbers = #tpu.dot_dimension_numbers<[1], [1], [0], [0], [0, 0, 1, 0], [], []>} : vector<8x256xbf16>, vector<32x256xbf16>, vector<8x32xf32> -> vector<8x32xf32>
    %c3_82 = arith.constant 3 : index
    %c0_83 = arith.constant 0 : index
    %c0_84 = arith.constant 0 : index
    %131 = vector.load %arg7[%c3_82, %c0_83, %c0_84] : memref<8x32x256xbf16, #tpu.memory_space<vmem>>, vector<1x32x256xbf16>
    %132 = vector.shape_cast %131 : vector<1x32x256xbf16> to vector<32x256xbf16>
    %cst_85 = arith.constant dense<0.000000e+00> : vector<8x32xf32>
    %133 = tpu.matmul %27, %132, %cst_85 {dimension_numbers = #tpu.dot_dimension_numbers<[1], [1], [0], [0], [0, 0, 1, 0], [], []>} : vector<8x256xbf16>, vector<32x256xbf16>, vector<8x32xf32> -> vector<8x32xf32>
    %134 = arith.truncf %127 : vector<16x32xf32> to vector<16x32xbf16>
    %135 = arith.truncf %130 : vector<8x32xf32> to vector<8x32xbf16>
    %cst_86 = arith.constant dense<0.000000e+00> : vector<16x8xf32>
    %136 = tpu.matmul %134, %135, %cst_86 {dimension_numbers = #tpu.dot_dimension_numbers<[1], [1], [0], [0], [0, 0, 1, 0], [], []>} : vector<16x32xbf16>, vector<8x32xbf16>, vector<16x8xf32> -> vector<16x8xf32>
    %cst_87 = arith.constant 1.250000e-01 : f32
    %137 = vector.broadcast %cst_87 : f32 to vector<16x8xf32>
    %138 = arith.mulf %136, %137 : vector<16x8xf32>
    %cst_88 = arith.constant dense<0xFF800000> : vector<16xf32>
    %139 = vector.multi_reduction <maximumf>, %138, %cst_88 [1] : vector<16x8xf32> to vector<16xf32>
    %140 = vector.shape_cast %139 : vector<16xf32> to vector<16x1xf32>
    %141 = vector.broadcast %140 : vector<16x1xf32> to vector<16x8xf32>
    %142 = arith.subf %138, %141 : vector<16x8xf32>
    %143 = math.exp %142 : vector<16x8xf32>
    %cst_89 = arith.constant dense<0.000000e+00> : vector<16xf32>
    %144 = vector.multi_reduction <add>, %143, %cst_89 [1] : vector<16x8xf32> to vector<16xf32>
    %145 = vector.shape_cast %144 : vector<16xf32> to vector<16x1xf32>
    %146 = tpu.reciprocal %145 {approx = true} : vector<16x1xf32> -> vector<16x1xf32>
    %147 = vector.broadcast %146 : vector<16x1xf32> to vector<16x8xf32>
    %148 = arith.mulf %143, %147 : vector<16x8xf32>
    %149 = arith.truncf %148 : vector<16x8xf32> to vector<16x8xbf16>
    %150 = arith.truncf %133 : vector<8x32xf32> to vector<8x32xbf16>
    %cst_90 = arith.constant dense<0.000000e+00> : vector<16x32xf32>
    %151 = tpu.matmul %149, %150, %cst_90 {dimension_numbers = #tpu.dot_dimension_numbers<[1], [0], [0], [1], [0, 0, 1, 1], [], []>} : vector<16x8xbf16>, vector<8x32xbf16>, vector<16x32xf32> -> vector<16x32xf32>
    %152 = arith.truncf %151 : vector<16x32xf32> to vector<16x32xbf16>
    %c3_91 = arith.constant 3 : index
    %c0_92 = arith.constant 0 : index
    %c0_93 = arith.constant 0 : index
    %153 = vector.load %arg8[%c3_91, %c0_92, %c0_93] : memref<8x32x256xbf16, #tpu.memory_space<vmem>>, vector<1x32x256xbf16>
    %154 = vector.shape_cast %153 : vector<1x32x256xbf16> to vector<32x256xbf16>
    %cst_94 = arith.constant dense<0.000000e+00> : vector<16x256xf32>
    %155 = tpu.matmul %152, %154, %cst_94 {dimension_numbers = #tpu.dot_dimension_numbers<[1], [0], [0], [1], [0, 0, 1, 1], [], []>} : vector<16x32xbf16>, vector<32x256xbf16>, vector<16x256xf32> -> vector<16x256xf32>
    %156 = arith.addf %124, %155 : vector<16x256xf32>
    %c4 = arith.constant 4 : index
    %c0_95 = arith.constant 0 : index
    %c0_96 = arith.constant 0 : index
    %157 = vector.load %arg5[%c4, %c0_95, %c0_96] : memref<8x32x256xbf16, #tpu.memory_space<vmem>>, vector<1x32x256xbf16>
    %158 = vector.shape_cast %157 : vector<1x32x256xbf16> to vector<32x256xbf16>
    %cst_97 = arith.constant dense<0.000000e+00> : vector<16x32xf32>
    %159 = tpu.matmul %26, %158, %cst_97 {dimension_numbers = #tpu.dot_dimension_numbers<[1], [1], [0], [0], [0, 0, 1, 0], [], []>} : vector<16x256xbf16>, vector<32x256xbf16>, vector<16x32xf32> -> vector<16x32xf32>
    %c4_98 = arith.constant 4 : index
    %c0_99 = arith.constant 0 : index
    %c0_100 = arith.constant 0 : index
    %160 = vector.load %arg6[%c4_98, %c0_99, %c0_100] : memref<8x32x256xbf16, #tpu.memory_space<vmem>>, vector<1x32x256xbf16>
    %161 = vector.shape_cast %160 : vector<1x32x256xbf16> to vector<32x256xbf16>
    %cst_101 = arith.constant dense<0.000000e+00> : vector<8x32xf32>
    %162 = tpu.matmul %27, %161, %cst_101 {dimension_numbers = #tpu.dot_dimension_numbers<[1], [1], [0], [0], [0, 0, 1, 0], [], []>} : vector<8x256xbf16>, vector<32x256xbf16>, vector<8x32xf32> -> vector<8x32xf32>
    %c4_102 = arith.constant 4 : index
    %c0_103 = arith.constant 0 : index
    %c0_104 = arith.constant 0 : index
    %163 = vector.load %arg7[%c4_102, %c0_103, %c0_104] : memref<8x32x256xbf16, #tpu.memory_space<vmem>>, vector<1x32x256xbf16>
    %164 = vector.shape_cast %163 : vector<1x32x256xbf16> to vector<32x256xbf16>
    %cst_105 = arith.constant dense<0.000000e+00> : vector<8x32xf32>
    %165 = tpu.matmul %27, %164, %cst_105 {dimension_numbers = #tpu.dot_dimension_numbers<[1], [1], [0], [0], [0, 0, 1, 0], [], []>} : vector<8x256xbf16>, vector<32x256xbf16>, vector<8x32xf32> -> vector<8x32xf32>
    %166 = arith.truncf %159 : vector<16x32xf32> to vector<16x32xbf16>
    %167 = arith.truncf %162 : vector<8x32xf32> to vector<8x32xbf16>
    %cst_106 = arith.constant dense<0.000000e+00> : vector<16x8xf32>
    %168 = tpu.matmul %166, %167, %cst_106 {dimension_numbers = #tpu.dot_dimension_numbers<[1], [1], [0], [0], [0, 0, 1, 0], [], []>} : vector<16x32xbf16>, vector<8x32xbf16>, vector<16x8xf32> -> vector<16x8xf32>
    %cst_107 = arith.constant 1.250000e-01 : f32
    %169 = vector.broadcast %cst_107 : f32 to vector<16x8xf32>
    %170 = arith.mulf %168, %169 : vector<16x8xf32>
    %cst_108 = arith.constant dense<0xFF800000> : vector<16xf32>
    %171 = vector.multi_reduction <maximumf>, %170, %cst_108 [1] : vector<16x8xf32> to vector<16xf32>
    %172 = vector.shape_cast %171 : vector<16xf32> to vector<16x1xf32>
    %173 = vector.broadcast %172 : vector<16x1xf32> to vector<16x8xf32>
    %174 = arith.subf %170, %173 : vector<16x8xf32>
    %175 = math.exp %174 : vector<16x8xf32>
    %cst_109 = arith.constant dense<0.000000e+00> : vector<16xf32>
    %176 = vector.multi_reduction <add>, %175, %cst_109 [1] : vector<16x8xf32> to vector<16xf32>
    %177 = vector.shape_cast %176 : vector<16xf32> to vector<16x1xf32>
    %178 = tpu.reciprocal %177 {approx = true} : vector<16x1xf32> -> vector<16x1xf32>
    %179 = vector.broadcast %178 : vector<16x1xf32> to vector<16x8xf32>
    %180 = arith.mulf %175, %179 : vector<16x8xf32>
    %181 = arith.truncf %180 : vector<16x8xf32> to vector<16x8xbf16>
    %182 = arith.truncf %165 : vector<8x32xf32> to vector<8x32xbf16>
    %cst_110 = arith.constant dense<0.000000e+00> : vector<16x32xf32>
    %183 = tpu.matmul %181, %182, %cst_110 {dimension_numbers = #tpu.dot_dimension_numbers<[1], [0], [0], [1], [0, 0, 1, 1], [], []>} : vector<16x8xbf16>, vector<8x32xbf16>, vector<16x32xf32> -> vector<16x32xf32>
    %184 = arith.truncf %183 : vector<16x32xf32> to vector<16x32xbf16>
    %c4_111 = arith.constant 4 : index
    %c0_112 = arith.constant 0 : index
    %c0_113 = arith.constant 0 : index
    %185 = vector.load %arg8[%c4_111, %c0_112, %c0_113] : memref<8x32x256xbf16, #tpu.memory_space<vmem>>, vector<1x32x256xbf16>
    %186 = vector.shape_cast %185 : vector<1x32x256xbf16> to vector<32x256xbf16>
    %cst_114 = arith.constant dense<0.000000e+00> : vector<16x256xf32>
    %187 = tpu.matmul %184, %186, %cst_114 {dimension_numbers = #tpu.dot_dimension_numbers<[1], [0], [0], [1], [0, 0, 1, 1], [], []>} : vector<16x32xbf16>, vector<32x256xbf16>, vector<16x256xf32> -> vector<16x256xf32>
    %188 = arith.addf %156, %187 : vector<16x256xf32>
    %c5 = arith.constant 5 : index
    %c0_115 = arith.constant 0 : index
    %c0_116 = arith.constant 0 : index
    %189 = vector.load %arg5[%c5, %c0_115, %c0_116] : memref<8x32x256xbf16, #tpu.memory_space<vmem>>, vector<1x32x256xbf16>
    %190 = vector.shape_cast %189 : vector<1x32x256xbf16> to vector<32x256xbf16>
    %cst_117 = arith.constant dense<0.000000e+00> : vector<16x32xf32>
    %191 = tpu.matmul %26, %190, %cst_117 {dimension_numbers = #tpu.dot_dimension_numbers<[1], [1], [0], [0], [0, 0, 1, 0], [], []>} : vector<16x256xbf16>, vector<32x256xbf16>, vector<16x32xf32> -> vector<16x32xf32>
    %c5_118 = arith.constant 5 : index
    %c0_119 = arith.constant 0 : index
    %c0_120 = arith.constant 0 : index
    %192 = vector.load %arg6[%c5_118, %c0_119, %c0_120] : memref<8x32x256xbf16, #tpu.memory_space<vmem>>, vector<1x32x256xbf16>
    %193 = vector.shape_cast %192 : vector<1x32x256xbf16> to vector<32x256xbf16>
    %cst_121 = arith.constant dense<0.000000e+00> : vector<8x32xf32>
    %194 = tpu.matmul %27, %193, %cst_121 {dimension_numbers = #tpu.dot_dimension_numbers<[1], [1], [0], [0], [0, 0, 1, 0], [], []>} : vector<8x256xbf16>, vector<32x256xbf16>, vector<8x32xf32> -> vector<8x32xf32>
    %c5_122 = arith.constant 5 : index
    %c0_123 = arith.constant 0 : index
    %c0_124 = arith.constant 0 : index
    %195 = vector.load %arg7[%c5_122, %c0_123, %c0_124] : memref<8x32x256xbf16, #tpu.memory_space<vmem>>, vector<1x32x256xbf16>
    %196 = vector.shape_cast %195 : vector<1x32x256xbf16> to vector<32x256xbf16>
    %cst_125 = arith.constant dense<0.000000e+00> : vector<8x32xf32>
    %197 = tpu.matmul %27, %196, %cst_125 {dimension_numbers = #tpu.dot_dimension_numbers<[1], [1], [0], [0], [0, 0, 1, 0], [], []>} : vector<8x256xbf16>, vector<32x256xbf16>, vector<8x32xf32> -> vector<8x32xf32>
    %198 = arith.truncf %191 : vector<16x32xf32> to vector<16x32xbf16>
    %199 = arith.truncf %194 : vector<8x32xf32> to vector<8x32xbf16>
    %cst_126 = arith.constant dense<0.000000e+00> : vector<16x8xf32>
    %200 = tpu.matmul %198, %199, %cst_126 {dimension_numbers = #tpu.dot_dimension_numbers<[1], [1], [0], [0], [0, 0, 1, 0], [], []>} : vector<16x32xbf16>, vector<8x32xbf16>, vector<16x8xf32> -> vector<16x8xf32>
    %cst_127 = arith.constant 1.250000e-01 : f32
    %201 = vector.broadcast %cst_127 : f32 to vector<16x8xf32>
    %202 = arith.mulf %200, %201 : vector<16x8xf32>
    %cst_128 = arith.constant dense<0xFF800000> : vector<16xf32>
    %203 = vector.multi_reduction <maximumf>, %202, %cst_128 [1] : vector<16x8xf32> to vector<16xf32>
    %204 = vector.shape_cast %203 : vector<16xf32> to vector<16x1xf32>
    %205 = vector.broadcast %204 : vector<16x1xf32> to vector<16x8xf32>
    %206 = arith.subf %202, %205 : vector<16x8xf32>
    %207 = math.exp %206 : vector<16x8xf32>
    %cst_129 = arith.constant dense<0.000000e+00> : vector<16xf32>
    %208 = vector.multi_reduction <add>, %207, %cst_129 [1] : vector<16x8xf32> to vector<16xf32>
    %209 = vector.shape_cast %208 : vector<16xf32> to vector<16x1xf32>
    %210 = tpu.reciprocal %209 {approx = true} : vector<16x1xf32> -> vector<16x1xf32>
    %211 = vector.broadcast %210 : vector<16x1xf32> to vector<16x8xf32>
    %212 = arith.mulf %207, %211 : vector<16x8xf32>
    %213 = arith.truncf %212 : vector<16x8xf32> to vector<16x8xbf16>
    %214 = arith.truncf %197 : vector<8x32xf32> to vector<8x32xbf16>
    %cst_130 = arith.constant dense<0.000000e+00> : vector<16x32xf32>
    %215 = tpu.matmul %213, %214, %cst_130 {dimension_numbers = #tpu.dot_dimension_numbers<[1], [0], [0], [1], [0, 0, 1, 1], [], []>} : vector<16x8xbf16>, vector<8x32xbf16>, vector<16x32xf32> -> vector<16x32xf32>
    %216 = arith.truncf %215 : vector<16x32xf32> to vector<16x32xbf16>
    %c5_131 = arith.constant 5 : index
    %c0_132 = arith.constant 0 : index
    %c0_133 = arith.constant 0 : index
    %217 = vector.load %arg8[%c5_131, %c0_132, %c0_133] : memref<8x32x256xbf16, #tpu.memory_space<vmem>>, vector<1x32x256xbf16>
    %218 = vector.shape_cast %217 : vector<1x32x256xbf16> to vector<32x256xbf16>
    %cst_134 = arith.constant dense<0.000000e+00> : vector<16x256xf32>
    %219 = tpu.matmul %216, %218, %cst_134 {dimension_numbers = #tpu.dot_dimension_numbers<[1], [0], [0], [1], [0, 0, 1, 1], [], []>} : vector<16x32xbf16>, vector<32x256xbf16>, vector<16x256xf32> -> vector<16x256xf32>
    %220 = arith.addf %188, %219 : vector<16x256xf32>
    %c6 = arith.constant 6 : index
    %c0_135 = arith.constant 0 : index
    %c0_136 = arith.constant 0 : index
    %221 = vector.load %arg5[%c6, %c0_135, %c0_136] : memref<8x32x256xbf16, #tpu.memory_space<vmem>>, vector<1x32x256xbf16>
    %222 = vector.shape_cast %221 : vector<1x32x256xbf16> to vector<32x256xbf16>
    %cst_137 = arith.constant dense<0.000000e+00> : vector<16x32xf32>
    %223 = tpu.matmul %26, %222, %cst_137 {dimension_numbers = #tpu.dot_dimension_numbers<[1], [1], [0], [0], [0, 0, 1, 0], [], []>} : vector<16x256xbf16>, vector<32x256xbf16>, vector<16x32xf32> -> vector<16x32xf32>
    %c6_138 = arith.constant 6 : index
    %c0_139 = arith.constant 0 : index
    %c0_140 = arith.constant 0 : index
    %224 = vector.load %arg6[%c6_138, %c0_139, %c0_140] : memref<8x32x256xbf16, #tpu.memory_space<vmem>>, vector<1x32x256xbf16>
    %225 = vector.shape_cast %224 : vector<1x32x256xbf16> to vector<32x256xbf16>
    %cst_141 = arith.constant dense<0.000000e+00> : vector<8x32xf32>
    %226 = tpu.matmul %27, %225, %cst_141 {dimension_numbers = #tpu.dot_dimension_numbers<[1], [1], [0], [0], [0, 0, 1, 0], [], []>} : vector<8x256xbf16>, vector<32x256xbf16>, vector<8x32xf32> -> vector<8x32xf32>
    %c6_142 = arith.constant 6 : index
    %c0_143 = arith.constant 0 : index
    %c0_144 = arith.constant 0 : index
    %227 = vector.load %arg7[%c6_142, %c0_143, %c0_144] : memref<8x32x256xbf16, #tpu.memory_space<vmem>>, vector<1x32x256xbf16>
    %228 = vector.shape_cast %227 : vector<1x32x256xbf16> to vector<32x256xbf16>
    %cst_145 = arith.constant dense<0.000000e+00> : vector<8x32xf32>
    %229 = tpu.matmul %27, %228, %cst_145 {dimension_numbers = #tpu.dot_dimension_numbers<[1], [1], [0], [0], [0, 0, 1, 0], [], []>} : vector<8x256xbf16>, vector<32x256xbf16>, vector<8x32xf32> -> vector<8x32xf32>
    %230 = arith.truncf %223 : vector<16x32xf32> to vector<16x32xbf16>
    %231 = arith.truncf %226 : vector<8x32xf32> to vector<8x32xbf16>
    %cst_146 = arith.constant dense<0.000000e+00> : vector<16x8xf32>
    %232 = tpu.matmul %230, %231, %cst_146 {dimension_numbers = #tpu.dot_dimension_numbers<[1], [1], [0], [0], [0, 0, 1, 0], [], []>} : vector<16x32xbf16>, vector<8x32xbf16>, vector<16x8xf32> -> vector<16x8xf32>
    %cst_147 = arith.constant 1.250000e-01 : f32
    %233 = vector.broadcast %cst_147 : f32 to vector<16x8xf32>
    %234 = arith.mulf %232, %233 : vector<16x8xf32>
    %cst_148 = arith.constant dense<0xFF800000> : vector<16xf32>
    %235 = vector.multi_reduction <maximumf>, %234, %cst_148 [1] : vector<16x8xf32> to vector<16xf32>
    %236 = vector.shape_cast %235 : vector<16xf32> to vector<16x1xf32>
    %237 = vector.broadcast %236 : vector<16x1xf32> to vector<16x8xf32>
    %238 = arith.subf %234, %237 : vector<16x8xf32>
    %239 = math.exp %238 : vector<16x8xf32>
    %cst_149 = arith.constant dense<0.000000e+00> : vector<16xf32>
    %240 = vector.multi_reduction <add>, %239, %cst_149 [1] : vector<16x8xf32> to vector<16xf32>
    %241 = vector.shape_cast %240 : vector<16xf32> to vector<16x1xf32>
    %242 = tpu.reciprocal %241 {approx = true} : vector<16x1xf32> -> vector<16x1xf32>
    %243 = vector.broadcast %242 : vector<16x1xf32> to vector<16x8xf32>
    %244 = arith.mulf %239, %243 : vector<16x8xf32>
    %245 = arith.truncf %244 : vector<16x8xf32> to vector<16x8xbf16>
    %246 = arith.truncf %229 : vector<8x32xf32> to vector<8x32xbf16>
    %cst_150 = arith.constant dense<0.000000e+00> : vector<16x32xf32>
    %247 = tpu.matmul %245, %246, %cst_150 {dimension_numbers = #tpu.dot_dimension_numbers<[1], [0], [0], [1], [0, 0, 1, 1], [], []>} : vector<16x8xbf16>, vector<8x32xbf16>, vector<16x32xf32> -> vector<16x32xf32>
    %248 = arith.truncf %247 : vector<16x32xf32> to vector<16x32xbf16>
    %c6_151 = arith.constant 6 : index
    %c0_152 = arith.constant 0 : index
    %c0_153 = arith.constant 0 : index
    %249 = vector.load %arg8[%c6_151, %c0_152, %c0_153] : memref<8x32x256xbf16, #tpu.memory_space<vmem>>, vector<1x32x256xbf16>
    %250 = vector.shape_cast %249 : vector<1x32x256xbf16> to vector<32x256xbf16>
    %cst_154 = arith.constant dense<0.000000e+00> : vector<16x256xf32>
    %251 = tpu.matmul %248, %250, %cst_154 {dimension_numbers = #tpu.dot_dimension_numbers<[1], [0], [0], [1], [0, 0, 1, 1], [], []>} : vector<16x32xbf16>, vector<32x256xbf16>, vector<16x256xf32> -> vector<16x256xf32>
    %252 = arith.addf %220, %251 : vector<16x256xf32>
    %c7 = arith.constant 7 : index
    %c0_155 = arith.constant 0 : index
    %c0_156 = arith.constant 0 : index
    %253 = vector.load %arg5[%c7, %c0_155, %c0_156] : memref<8x32x256xbf16, #tpu.memory_space<vmem>>, vector<1x32x256xbf16>
    %254 = vector.shape_cast %253 : vector<1x32x256xbf16> to vector<32x256xbf16>
    %cst_157 = arith.constant dense<0.000000e+00> : vector<16x32xf32>
    %255 = tpu.matmul %26, %254, %cst_157 {dimension_numbers = #tpu.dot_dimension_numbers<[1], [1], [0], [0], [0, 0, 1, 0], [], []>} : vector<16x256xbf16>, vector<32x256xbf16>, vector<16x32xf32> -> vector<16x32xf32>
    %c7_158 = arith.constant 7 : index
    %c0_159 = arith.constant 0 : index
    %c0_160 = arith.constant 0 : index
    %256 = vector.load %arg6[%c7_158, %c0_159, %c0_160] : memref<8x32x256xbf16, #tpu.memory_space<vmem>>, vector<1x32x256xbf16>
    %257 = vector.shape_cast %256 : vector<1x32x256xbf16> to vector<32x256xbf16>
    %cst_161 = arith.constant dense<0.000000e+00> : vector<8x32xf32>
    %258 = tpu.matmul %27, %257, %cst_161 {dimension_numbers = #tpu.dot_dimension_numbers<[1], [1], [0], [0], [0, 0, 1, 0], [], []>} : vector<8x256xbf16>, vector<32x256xbf16>, vector<8x32xf32> -> vector<8x32xf32>
    %c7_162 = arith.constant 7 : index
    %c0_163 = arith.constant 0 : index
    %c0_164 = arith.constant 0 : index
    %259 = vector.load %arg7[%c7_162, %c0_163, %c0_164] : memref<8x32x256xbf16, #tpu.memory_space<vmem>>, vector<1x32x256xbf16>
    %260 = vector.shape_cast %259 : vector<1x32x256xbf16> to vector<32x256xbf16>
    %cst_165 = arith.constant dense<0.000000e+00> : vector<8x32xf32>
    %261 = tpu.matmul %27, %260, %cst_165 {dimension_numbers = #tpu.dot_dimension_numbers<[1], [1], [0], [0], [0, 0, 1, 0], [], []>} : vector<8x256xbf16>, vector<32x256xbf16>, vector<8x32xf32> -> vector<8x32xf32>
    %262 = arith.truncf %255 : vector<16x32xf32> to vector<16x32xbf16>
    %263 = arith.truncf %258 : vector<8x32xf32> to vector<8x32xbf16>
    %cst_166 = arith.constant dense<0.000000e+00> : vector<16x8xf32>
    %264 = tpu.matmul %262, %263, %cst_166 {dimension_numbers = #tpu.dot_dimension_numbers<[1], [1], [0], [0], [0, 0, 1, 0], [], []>} : vector<16x32xbf16>, vector<8x32xbf16>, vector<16x8xf32> -> vector<16x8xf32>
    %cst_167 = arith.constant 1.250000e-01 : f32
    %265 = vector.broadcast %cst_167 : f32 to vector<16x8xf32>
    %266 = arith.mulf %264, %265 : vector<16x8xf32>
    %cst_168 = arith.constant dense<0xFF800000> : vector<16xf32>
    %267 = vector.multi_reduction <maximumf>, %266, %cst_168 [1] : vector<16x8xf32> to vector<16xf32>
    %268 = vector.shape_cast %267 : vector<16xf32> to vector<16x1xf32>
    %269 = vector.broadcast %268 : vector<16x1xf32> to vector<16x8xf32>
    %270 = arith.subf %266, %269 : vector<16x8xf32>
    %271 = math.exp %270 : vector<16x8xf32>
    %cst_169 = arith.constant dense<0.000000e+00> : vector<16xf32>
    %272 = vector.multi_reduction <add>, %271, %cst_169 [1] : vector<16x8xf32> to vector<16xf32>
    %273 = vector.shape_cast %272 : vector<16xf32> to vector<16x1xf32>
    %274 = tpu.reciprocal %273 {approx = true} : vector<16x1xf32> -> vector<16x1xf32>
    %275 = vector.broadcast %274 : vector<16x1xf32> to vector<16x8xf32>
    %276 = arith.mulf %271, %275 : vector<16x8xf32>
    %277 = arith.truncf %276 : vector<16x8xf32> to vector<16x8xbf16>
    %278 = arith.truncf %261 : vector<8x32xf32> to vector<8x32xbf16>
    %cst_170 = arith.constant dense<0.000000e+00> : vector<16x32xf32>
    %279 = tpu.matmul %277, %278, %cst_170 {dimension_numbers = #tpu.dot_dimension_numbers<[1], [0], [0], [1], [0, 0, 1, 1], [], []>} : vector<16x8xbf16>, vector<8x32xbf16>, vector<16x32xf32> -> vector<16x32xf32>
    %280 = arith.truncf %279 : vector<16x32xf32> to vector<16x32xbf16>
    %c7_171 = arith.constant 7 : index
    %c0_172 = arith.constant 0 : index
    %c0_173 = arith.constant 0 : index
    %281 = vector.load %arg8[%c7_171, %c0_172, %c0_173] : memref<8x32x256xbf16, #tpu.memory_space<vmem>>, vector<1x32x256xbf16>
    %282 = vector.shape_cast %281 : vector<1x32x256xbf16> to vector<32x256xbf16>
    %cst_174 = arith.constant dense<0.000000e+00> : vector<16x256xf32>
    %283 = tpu.matmul %280, %282, %cst_174 {dimension_numbers = #tpu.dot_dimension_numbers<[1], [0], [0], [1], [0, 0, 1, 1], [], []>} : vector<16x32xbf16>, vector<32x256xbf16>, vector<16x256xf32> -> vector<16x256xf32>
    %284 = arith.addf %252, %283 : vector<16x256xf32>
    %c0_175 = arith.constant 0 : index
    %c0_176 = arith.constant 0 : index
    %285 = vector.load %arg9[%c0_175, %c0_176] : memref<1x256xf32, #tpu.memory_space<vmem>>, vector<1x256xf32>
    %286 = vector.broadcast %285 : vector<1x256xf32> to vector<16x256xf32>
    %287 = arith.addf %284, %286 : vector<16x256xf32>
    %c0_177 = arith.constant 0 : index
    %c0_178 = arith.constant 0 : index
    %c0_179 = arith.constant 0 : index
    %288 = vector.load %arg10[%c0_177, %c0_178, %c0_179] : memref<1x16x256xf32, #tpu.memory_space<vmem>>, vector<1x16x256xf32>
    %289 = vector.shape_cast %288 : vector<1x16x256xf32> to vector<16x256xf32>
    %290 = vector.shape_cast %287 : vector<16x256xf32> to vector<1x16x256xf32>
    tpu.vector_store %arg10[%c0_177, %c0_178, %c0_179], %290 {strides = array<i32>} : memref<1x16x256xf32, #tpu.memory_space<vmem>>, vector<1x16x256xf32>,
    return
  }
  func.func @transform_0(%arg0: i32) -> (i32, i32, i32) {
    %c0_i32 = arith.constant 0 : i32
    %c0_i32_0 = arith.constant 0 : i32
    %c0_i32_1 = arith.constant 0 : i32
    return %arg0, %c0_i32, %c0_i32_0 : i32, i32, i32
  }
  func.func @transform_1(%arg0: i32) -> (i32, i32, i32) {
    %c0_i32 = arith.constant 0 : i32
    %c0_i32_0 = arith.constant 0 : i32
    %c0_i32_1 = arith.constant 0 : i32
    return %arg0, %c0_i32, %c0_i32_0 : i32, i32, i32
  }
  func.func @transform_2(%arg0: i32) -> (i32, i32) {
    %c0_i32 = arith.constant 0 : i32
    %c0_i32_0 = arith.constant 0 : i32
    %c0_i32_1 = arith.constant 0 : i32
    return %c0_i32, %c0_i32_0 : i32, i32
  }
  func.func @transform_3(%arg0: i32) -> (i32, i32) {
    %c0_i32 = arith.constant 0 : i32
    %c0_i32_0 = arith.constant 0 : i32
    %c0_i32_1 = arith.constant 0 : i32
    return %c0_i32, %c0_i32_0 : i32, i32
  }
  func.func @transform_4(%arg0: i32) -> (i32, i32, i32) {
    %c0_i32 = arith.constant 0 : i32
    %c0_i32_0 = arith.constant 0 : i32
    %c0_i32_1 = arith.constant 0 : i32
    %c0_i32_2 = arith.constant 0 : i32
    return %c0_i32, %c0_i32_0, %c0_i32_1 : i32, i32, i32
  }
  func.func @transform_5(%arg0: i32) -> (i32, i32, i32) {
    %c0_i32 = arith.constant 0 : i32
    %c0_i32_0 = arith.constant 0 : i32
    %c0_i32_1 = arith.constant 0 : i32
    %c0_i32_2 = arith.constant 0 : i32
    return %c0_i32, %c0_i32_0, %c0_i32_1 : i32, i32, i32
  }
  func.func @transform_6(%arg0: i32) -> (i32, i32, i32) {
    %c0_i32 = arith.constant 0 : i32
    %c0_i32_0 = arith.constant 0 : i32
    %c0_i32_1 = arith.constant 0 : i32
    %c0_i32_2 = arith.constant 0 : i32
    return %c0_i32, %c0_i32_0, %c0_i32_1 : i32, i32, i32
  }
  func.func @transform_7(%arg0: i32) -> (i32, i32, i32) {
    %c0_i32 = arith.constant 0 : i32
    %c0_i32_0 = arith.constant 0 : i32
    %c0_i32_1 = arith.constant 0 : i32
    %c0_i32_2 = arith.constant 0 : i32
    return %c0_i32, %c0_i32_0, %c0_i32_1 : i32, i32, i32
  }
  func.func @transform_8(%arg0: i32) -> (i32, i32) {
    %c0_i32 = arith.constant 0 : i32
    %c0_i32_0 = arith.constant 0 : i32
    %c0_i32_1 = arith.constant 0 : i32
    return %c0_i32, %c0_i32_0 : i32, i32
  }
  func.func @transform_9(%arg0: i32) -> (i32, i32, i32) {
    %c0_i32 = arith.constant 0 : i32
    %c0_i32_0 = arith.constant 0 : i32
    %c0_i32_1 = arith.constant 0 : i32
    return %arg0, %c0_i32, %c0_i32_0 : i32, i32, i32
  }
}

</mosaic_0001>

<bundles_post_ra>
// kernel: prenorm_forward.1
= control target key start
LH: loop header
LB: loop body
LE: loop exit
PB: predicated region body
PF: predicated region fallthrough
CT: control target
= control target key end

     0   :  { %s5436_s0 = inlined_call_operand.hbm [shape: f32[2,8,256], index: 0, kind: input, shape index: {}]   ;;  %s5437_s1 = inlined_call_operand.hbm [shape: f32[2,16,256], index: 1, kind: input, shape index: {}]   ;;  %s5438_s2 = inlined_call_operand.vmem [shape: f32[1,256], index: 2, kind: input, shape index: {}]   ;;  %s5439_s3 = inlined_call_operand.vmem [shape: f32[1,256], index: 3, kind: input, shape index: {}]   ;;  %s5440_s4 = inlined_call_operand.hbm [shape: bf16[8,32,256], index: 4, kind: input, shape index: {}]   ;;  %s5441_s5 = inlined_call_operand.hbm [shape: bf16[8,32,256], index: 5, kind: input, shape index: {}]   ;;  %s5442_s6 = inlined_call_operand.hbm [shape: bf16[8,32,256], index: 6, kind: input, shape index: {}]   ;;  %s5443_s7 = inlined_call_operand.hbm [shape: bf16[8,32,256], index: 7, kind: input, shape index: {}]   ;;  %s5444_s8 = inlined_call_operand.vmem [shape: f32[1,256], index: 8, kind: input, shape index: {}]   ;;  %s5445_s9 = inlined_call_operand.hbm [shape: f32[2,16,256], index: 9, kind: output, shape index: {}]  }
   0x1   :  { %5450 = sst [smem:[#allocation20_spill]] %s5436_s0 }
   0x2   :  { %5451 = sst [smem:[#allocation21_spill]] %s5440_s4 }
   0x3   :  { %5452 = sst [smem:[#allocation22_spill]] %s5441_s5 }
   0x4   :  { %5453 = sst [smem:[#allocation23_spill]] %s5442_s6 }
   0x5   :  { %5454 = sst [smem:[#allocation24_spill]] %s5445_s9 }
   0x6   :  { %14 = vsyncpa [#allocation3], 0 }
   0x7   :  { %16 = vsyncpa [#allocation3 + $0x1], 0 }
   0x8   :  { %17 = vsyncpa [#allocation6], 0 }
   0x9   :  { %19 = vsyncpa [#allocation6 + $0x1], 0 }
   0xa   :  { %20 = vsyncpa [#allocation9], 0 }
   0xb   :  { %21 = vsyncpa [#allocation12], 0 }
   0xc   :  { %22 = vsyncpa [#allocation4], 0 }
   0xd   :  { %24 = vsyncpa [#allocation4 + $0x1], 0  ;;  %s4832_s30 = smov 0   ;;  %s4834_s10 = smov 0  }
   0xe   :  { %s4836_s11 = smov 0   ;;  %s4838_s12 = smov 0  }
   0xf LB: > { %s4766_s13 = smov [#allocation7]   ;;  %s4853_s15 = sadd.s32 4294967295, %s4764_s12   ;;  %s4764_s12 = sphi %s4838_s12, %s5483_s12   ;;  %s4760_s11 = sphi %s4836_s11, %s5482_s11   ;;  %s4756_s10 = sphi %s4834_s10, %s5481_s10   ;;  %s4752_s30 = sphi %s4832_s30, %s5480_s30  }
  0x10   : > { %s278_s14 = sshll.u32 %s4766_s13, 4  ;;  %p3815_p0 = scmp.ge.s32.totalorder %s4764_s12, 1  ;;  %s4858_s14 = int_to_ptr.vmem [resolvable:$true] %s278_s14 }
  0x11   : > { %p5447_p1 = scmp.eq.s32.totalorder %s4853_s15, 0  ;;  %p260_p2 = scmp.lt.s32.totalorder %s4764_s12, 3 }
  0x12   : > { %s4767_s17 = smov [#allocation8]   ;;  %s4768_s20 = smov [#allocation10]  }
  0x13   : > { %p4860_p3 = pnand %p3815_p0, %p260_p2  ;;  %s291_s18 = sshll.u32 %s4767_s17, 4  ;;  %s4873_s18 = int_to_ptr.vmem [resolvable:$true] %s291_s18 }
  0x14   : > { %s304_s21 = sshll.u32 %s4768_s20, 4  ;;  %s5457_s4 = sld [smem:[#allocation21_spill]]  ;;  %s4875_s21 = int_to_ptr.vmem [resolvable:$true] %s304_s21 }
  0x15   : > { %s5455_s16 = scalar_select %p4860_p3, 1, 0 }
  0x16   : > { %p4173_p5 = pneg %p4860_p3 }
  0x18   : > { %p4869_p6 = pnand %p4173_p5, %p5447_p1 }
  0x1a   : > { %s4510_s24 = scalar_lea.hbm %s5457_s4, 4096  ;;  %p4885_p8 = pneg %p4869_p6 }
  0x1b   : > { %p4511_p7 = scmp.ne.s32.totalorder %s5457_s4, %s4510_s24  ;;  %p4517_p11 = scmp.lt.u32.totalorder %s4510_s24, %s5457_s4 }
  0x1d   : > { %p4513_p9 = pnand %p4885_p8, %p4511_p7 }
  0x1f   : > { %p4514_p10 = pneg %p4513_p9 }
  0x21   : > { %p4519_p12 = pnand %p4517_p11, %p4514_p10 }
  0x23   : > { %4522 = shalt.err (!%p4519_p12)
}
  0x24   : > { %s4523_s13 = scalar_lea.vmem %s4858_s14, 4096  ;;  %p4531_p5 = scmp.lt.s32.totalorder %s4858_s14, %s4858_s14 }
  0x25   : > { %p4524_p13 = scmp.ne.s32.totalorder %s4858_s14, %s4523_s13  ;;  %p4532_p4 = scmp.lt.s32.totalorder %s4523_s13, %s4523_s13 }
  0x27   : > { %p4526_p0 = pnand %p4524_p13, %p4885_p8  ;;  %p4533_p7 = por %p4532_p4, %p4531_p5 }
  0x29   : > { %p4527_p2 = pneg %p4526_p0 }
  0x2b   : > { %p4534_p9 = pnand %p4533_p7, %p4527_p2 }
  0x2d   : > { %4537 = shalt.err (!%p4534_p9)
}
  0x2e   : > { %s4769_s17 = smov 128   ;;  %s4770_s20 = smov 8  }
  0x2f   : > { %4176 = dma.hbm_to_vmem [thread:$0]  (!%p4869_p6), %s5457_s4, 4096, %s4858_s14, [#allocation6], %s4769_s17, %s4769_s17, %s4770_s20  }
  0x30   : > { %s5459_s5 = sld [smem:[#allocation22_spill]] }
  0x36   : > { %s4538_s26 = scalar_lea.hbm %s5459_s5, 4096 }
  0x37   : > { %p4539_p4 = scmp.ne.s32.totalorder %s5459_s5, %s4538_s26  ;;  %p4545_p12 = scmp.lt.u32.totalorder %s4538_s26, %s5459_s5 }
  0x39   : > { %p4541_p10 = pnand %p4539_p4, %p4885_p8 }
  0x3b   : > { %p4542_p11 = pneg %p4541_p10 }
  0x3d   : > { %p4547_p13 = pnand %p4545_p12, %p4542_p11 }
  0x3f   : > { %4550 = shalt.err (!%p4547_p13)
}
  0x40   : > { %s4551_s14 = scalar_lea.vmem %s4873_s18, 4096  ;;  %p4559_p7 = scmp.lt.s32.totalorder %s4873_s18, %s4873_s18 }
  0x41   : > { %p4552_p0 = scmp.ne.s32.totalorder %s4873_s18, %s4551_s14  ;;  %p4560_p9 = scmp.lt.s32.totalorder %s4551_s14, %s4551_s14 }
  0x43   : > { %p4554_p2 = pnand %p4552_p0, %p4885_p8  ;;  %p4561_p4 = por %p4560_p9, %p4559_p7 }
  0x45   : > { %p4555_p5 = pneg %p4554_p2 }
  0x47   : > { %p4562_p10 = pnand %p4561_p4, %p4555_p5 }
  0x49   : > { %4565 = shalt.err (!%p4562_p10)
}
  0x4a   : > { %4179 = dma.hbm_to_vmem [thread:$0]  (!%p4869_p6), %s5459_s5, 4096, %s4873_s18, [#allocation9], %s4769_s17, %s4769_s17, %s4770_s20  }
  0x4b   : > { %s5460_s6 = sld [smem:[#allocation23_spill]] }
  0x51   : > { %s4566_s25 = scalar_lea.hbm %s5460_s6, 4096 }
  0x52   : > { %p4567_p11 = scmp.ne.s32.totalorder %s5460_s6, %s4566_s25  ;;  %p4573_p0 = scmp.lt.u32.totalorder %s4566_s25, %s5460_s6 }
  0x54   : > { %p4569_p12 = pnand %p4567_p11, %p4885_p8 }
  0x56   : > { %p4570_p13 = pneg %p4569_p12 }
  0x58   : > { %p4575_p2 = pnand %p4573_p0, %p4570_p13 }
  0x5a   : > { %4578 = shalt.err (!%p4575_p2)
}
  0x5b   : > { %s4579_s18 = scalar_lea.vmem %s4875_s21, 4096  ;;  %p4587_p4 = scmp.lt.s32.totalorder %s4875_s21, %s4875_s21 }
  0x5c   : > { %p4580_p5 = scmp.ne.s32.totalorder %s4875_s21, %s4579_s18  ;;  %p4588_p10 = scmp.lt.s32.totalorder %s4579_s18, %s4579_s18 }
  0x5e   : > { %p4582_p7 = pnand %p4580_p5, %p4885_p8  ;;  %p4589_p11 = por %p4588_p10, %p4587_p4 }
  0x60   : > { %p4583_p9 = pneg %p4582_p7 }
  0x62   : > { %p4590_p12 = pnand %p4589_p11, %p4583_p9 }
  0x64   : > { %4593 = shalt.err (!%p4590_p12)
}
  0x65   : > { %4182 = dma.hbm_to_vmem [thread:$0]  (!%p4869_p6), %s5460_s6, 4096, %s4875_s21, [#allocation9], %s4769_s17, %s4769_s17, %s4770_s20  }
  0x66   : > { %s4771_s22 = smov [#allocation11]   ;;  %s4594_s26 = scalar_lea.hbm %s5443_s7, 4096 }
  0x67   : > { %s317_s23 = sshll.u32 %s4771_s22, 4  ;;  %p4595_p13 = scmp.ne.s32.totalorder %s5443_s7, %s4594_s26  ;;  %s318_s23 = int_to_ptr.vmem [resolvable:$true] %s317_s23 }
  0x68   : > { %p4601_p5 = scmp.lt.u32.totalorder %s4594_s26, %s5443_s7 }
  0x69   : > { %p4597_p0 = pnand %p4595_p13, %p4885_p8 }
  0x6b   : > { %p4598_p2 = pneg %p4597_p0 }
  0x6d   : > { %p4603_p7 = pnand %p4601_p5, %p4598_p2 }
  0x6f   : > { %4606 = shalt.err (!%p4603_p7)
}
  0x70   : > { %s4607_s21 = scalar_lea.vmem %s318_s23, 4096  ;;  %p4615_p11 = scmp.lt.s32.totalorder %s318_s23, %s318_s23 }
  0x71   : > { %p4608_p9 = scmp.ne.s32.totalorder %s318_s23, %s4607_s21  ;;  %p4616_p12 = scmp.lt.s32.totalorder %s4607_s21, %s4607_s21 }
  0x73   : > { %p4610_p4 = pnand %p4608_p9, %p4885_p8  ;;  %p4617_p1 = por %p4616_p12, %p4615_p11 }
  0x75   : > { %p4611_p10 = pneg %p4610_p4 }
  0x77   : > { %p4618_p3 = pnand %p4617_p1, %p4611_p10 }
  0x79   : > { %4621 = shalt.err (!%p4618_p3)
}
  0x7a   : > { %4185 = dma.hbm_to_vmem [thread:$0]  (!%p4869_p6), %s5443_s7, 4096, %s318_s23, [#allocation12], %s4769_s17, %s4769_s17, %s4770_s20  }
  0x7b   : > { %s3814_s19 = sadd.s32 4294967294, %s4764_s12   ;;  %s4984_s27 = sadd.s32 1, %s4764_s12  }
  0x7c   : > { %s34_s22 = ssub.s32 %s4764_s12, %s4984_s27  ;;  %s37_s24 = sadd.s32 1, %s4760_s11 }
  0x7d   : > { %p35_p1 = scmp.eq.s32.totalorder %s34_s22, 0  ;;  %p44_p3 = scmp.ne.s32.totalorder %s4760_s11, %s4756_s10 }
  0x7e   : > { %p45_p8 = scmp.eq.s32.totalorder %s4764_s12, 0  ;;  %p50_p13 = scmp.ne.s32.totalorder %s4756_s10, %s4752_s30 }
  0x7f   : > { %s4995_s25 = scalar_select %p35_p1, %s4760_s11, %s37_s24  }
  0x80   : > { %p4997_p0 = por %p45_p8, %p44_p3  ;;  %p5462_p2 = scmp.eq.s32.totalorder %s4853_s15, 0 }
  0x81   : > { %p247_p5 = scmp.eq.s32.totalorder %s4853_s15, 1  ;;  %p253_p7 = scmp.eq.s32.totalorder %s3814_s19, 1 }
  0x82   : > { %p5003_p6 = por %p5462_p2, %p50_p13  ;;  %p4201_p9 = scmp.lt.s32.totalorder %s4764_s12, 2 }
  0x83   : > { %s5010_s20 = sand.u32 1, %s4760_s11   ;;  %p5012_p4 = por %p247_p5, %p44_p3 }
  0x84   : > { %p5016_p10 = por %p253_p7, %p50_p13  ;;  %s3821_s29 = sshll.u32 %s5010_s20, 4 }
  0x85   : > { %s5464_s23 = scalar_select %p5012_p4, 1, 0 }
  0x86   : > { %s5465_s28 = scalar_select %p5016_p10, 1, 0 }
  0x87   : > { %s3992_s13 = sshll.u32 %s4764_s12, 8  ;;  %s5466_s0 = sld [smem:[#allocation20_spill]] }
  0x88   : > { %s338_s9 = scalar_lea.vmem [#allocation2], %s3821_s29  ;;  %p5031_p11 = pnand %p4201_p9, %p4997_p0 }
  0x89   : > { %s346_s19 = sshll.u32 %s338_s9, 4  ;;  %s3824_s24 = sshll.u32 %s5010_s20, 5  ;;  %s5027_s19 = int_to_ptr.vmem [resolvable:$true] %s346_s19 }
  0x8a   : > { %s335_s18 = scalar_lea.sflag [#allocation3], %s5010_s20  ;;  %p4624_p1 = pneg %p5031_p11 }
  0x8d   : > { %s5025_s14 = scalar_lea.hbm %s5466_s0, %s3992_s13  ;;  %s4627_s26 = scalar_lea.hbm %s5466_s0, 512 }
  0x8e   : > { %s4622_s13 = scalar_lea.hbm %s5025_s14, 256  ;;  %p4628_p13 = scmp.lt.u32.totalorder %s5025_s14, %s5466_s0 }
  0x8f   : > { %p4623_p12 = scmp.ne.s32.totalorder %s5025_s14, %s4622_s13  ;;  %p4629_p0 = scmp.lt.u32.totalorder %s4627_s26, %s4622_s13 }
  0x90   : > { %p4631_p5 = scmp.lt.u32.totalorder %s4622_s13, %s5025_s14 }
  0x91   : > { %p4625_p3 = pnand %p4624_p1, %p4623_p12  ;;  %p4630_p2 = por %p4629_p0, %p4628_p13 }
  0x93   : > { %p4626_p8 = pneg %p4625_p3  ;;  %p4632_p7 = por %p4631_p5, %p4630_p2 }
  0x95   : > { %p4633_p9 = pnand %p4632_p7, %p4626_p8 }
  0x97   : > { %4636 = shalt.err (!%p4633_p9)
}
  0x98   : > { %s4637_s4 = scalar_lea.vmem %s5027_s19, 256  ;;  %s4772_s29 = smov [#allocation2]  }
  0x99   : > { %p4638_p12 = scmp.ne.s32.totalorder %s5027_s19, %s4637_s4  ;;  %s4642_s21 = sshll.u32 %s4772_s29, 4  ;;  %s4643_s21 = int_to_ptr.vmem [resolvable:$false] %s4642_s21 }
  0x9a   : > { %s4644_s5 = scalar_lea.vmem %s4643_s21, 512  ;;  %p4645_p4 = scmp.lt.s32.totalorder %s5027_s19, %s4643_s21 }
  0x9b   : > { %p4640_p3 = pnand %p4638_p12, %p4624_p1  ;;  %p4646_p13 = scmp.lt.s32.totalorder %s4644_s5, %s4637_s4 }
  0x9d   : > { %p4641_p10 = pneg %p4640_p3  ;;  %p4647_p0 = por %p4646_p13, %p4645_p4 }
  0x9f   : > { %p4648_p2 = pnand %p4647_p0, %p4641_p10 }
  0xa1   : > { %4651 = shalt.err (!%p4648_p2)
}
  0xa2   : > { %4189 = dma.hbm_to_vmem [thread:$0]  (!%p5031_p11), %s5025_s14, 256, %s5027_s19, %s335_s18  }
  0xa3   : > { %s357_s13 = scalar_lea.vmem [#allocation5], %s3824_s24  ;;  %s3993_s9 = sshll.u32 %s4764_s12, 9 }
  0xa4   : > { %s364_s26 = sshll.u32 %s357_s13, 4  ;;  %s5071_s21 = scalar_lea.hbm %s5437_s1, %s3993_s9  ;;  %s5065_s26 = int_to_ptr.vmem [resolvable:$true] %s364_s26 }
  0xa5   : > { %s5468_s5 = sand.u32 1, %s4764_s12   ;;  %s4652_s6 = scalar_lea.hbm %s5071_s21, 512 }
  0xa6   : > { %s5075_s0 = scalar_lea.sflag [#allocation6], %s5468_s5  ;;  %p4653_p4 = scmp.ne.s32.totalorder %s5071_s21, %s4652_s6 }
  0xa7   : > { %s4657_s19 = scalar_lea.hbm %s5437_s1, 1024  ;;  %p4658_p5 = scmp.lt.u32.totalorder %s5071_s21, %s5437_s1 }
  0xa8   : > { %p4655_p10 = pnand %p4653_p4, %p4624_p1  ;;  %p4659_p7 = scmp.lt.u32.totalorder %s4657_s19, %s4652_s6 }
  0xa9   : > { %p4661_p12 = scmp.lt.u32.totalorder %s4652_s6, %s5071_s21 }
  0xaa   : > { %p4656_p8 = pneg %p4655_p10  ;;  %p4660_p9 = por %p4659_p7, %p4658_p5 }
  0xac   : > { %p4662_p3 = por %p4661_p12, %p4660_p9 }
  0xae   : > { %p4663_p13 = pnand %p4662_p3, %p4656_p8 }
  0xb0   : > { %4666 = shalt.err (!%p4663_p13)
}
  0xb1   : > { %s4667_s13 = scalar_lea.vmem %s5065_s26, 512  ;;  %s4773_s9 = smov [#allocation5]  }
  0xb2   : > { %p4668_p0 = scmp.ne.s32.totalorder %s5065_s26, %s4667_s13  ;;  %s4672_s29 = sshll.u32 %s4773_s9, 4  ;;  %s4673_s29 = int_to_ptr.vmem [resolvable:$false] %s4672_s29 }
  0xb3   : > { %s4674_s4 = scalar_lea.vmem %s4673_s29, 1024  ;;  %p4675_p10 = scmp.lt.s32.totalorder %s5065_s26, %s4673_s29 }
  0xb4   : > { %p4670_p2 = pnand %p4668_p0, %p4624_p1  ;;  %p4676_p5 = scmp.lt.s32.totalorder %s4674_s4, %s4667_s13 }
  0xb6   : > { %p4671_p4 = pneg %p4670_p2  ;;  %p4677_p7 = por %p4676_p5, %p4675_p10 }
  0xb8   : > { %p4678_p9 = pnand %p4677_p7, %p4671_p4 }
  0xba   : > { %4681 = shalt.err (!%p4678_p9)
}
  0xbb   : > { %s4774_s6 = smov 256   ;;  %s4775_s5 = smov 16  }
  0xbc   : > { %4192 = dma.hbm_to_vmem [thread:$0]  (!%p5031_p11), %s5071_s21, 512, %s5065_s26, %s5075_s0, %s4774_s6, %s4774_s6, %s4775_s5  }
  0xbd   : > { %p5469_p1 = scmp.ne.s32.totalorder %s5455_s16, 0 }
  0xbe   : > { %s5104_s20 = sand.u32 (!%p5469_p1), 1, %s4756_s10  }
  0xbf   : > { %376 = sbr.rel (%p5469_p1) target bundleno = 8417 (0x20e1), region = 56  ;;  %s3828_s14 = sshll.u32 (!%p5469_p1), %s5104_s20, 4 }
  0xc0   : > { %s379_s19 = scalar_lea.sflag (!%p5469_p1), [#allocation3], %s5104_s20  ;;  %s382_s24 = scalar_lea.vmem (!%p5469_p1), [#allocation2], %s3828_s14 }
  0xc6   : > { %4727 = dma.done.wait (%p5003_p6), %s379_s19, 256  }
  0xc7   : > { %4729 = vsyncadd (%p5003_p6), %s379_s19, 4294967040  ;;  %s387_s0 = sand.u32 1, %s4853_s15   ;;  %s3829_s16 = sshll.u32 %s5104_s20, 5 }
  0xc8   : > { %s388_s22 = scalar_lea.sflag [#allocation6], %s387_s0  ;;  %s5116_s26 = scalar_lea.vmem [#allocation5], %s3829_s16 }
  0xc9   : > { %4731 = dma.done.wait (%p5003_p6), %s388_s22, 512  }
  0xca   : > { %4733 = vsyncadd (%p5003_p6), %s388_s22, 4294966784  ;;  %p5470_p11 = scmp.eq.s32.totalorder %s4853_s15, 0 }
  0xcc   : > { %4735 = dma.done.wait (%p5470_p11), [#allocation6], 4096   ;;  %p5471_p8 = pmov %p5470_p11 }
  0xce   : > { %4737 = vsyncadd (%p5471_p8), [#allocation6], 4294963200  ;;  %p5472_p12 = pmov %p5471_p8 }
  0xcf   : > { %p5473_p3 = pmov %p5471_p8 }
  0xd0   : > { %4739 = dma.done.wait (%p5472_p12), [#allocation9], 8192  }
  0xd1   : > { %4741 = vsyncadd (%p5473_p3), [#allocation9], 4294959104  ;;  %p5474_p13 = pmov %p5473_p3 }
  0xd2   : > { %p5475_p0 = pmov %p5473_p3 }
  0xd3   : > { %4743 = dma.done.wait (%p5474_p13), [#allocation12], 4096  }
  0xd4   : > { %4745 = vsyncadd (%p5475_p0), [#allocation12], 4294963200  ;;  %v448_v0 = vld [vmem:[%s382_s24] sm:$0xff]  ;;  %v449_v1 = vld [vmem:[%s382_s24 + $0x8] sm:$0xff]  ;;  %v469_v31 = vlaneseq  ;;  %v4776_v63 = vmov 0.0   ;;  %vm4777_vm0 = vmmov 0  }
  0xd5   : > { %v450_v2 = vadd.f32 %v449_v1, %v448_v0  ;;  %v4252_v3 = vld [vmem:[#allocation7 + $0x4] ss:$8 sps:$4 sm:$0xff]   ;;  %v4254_v4 = vld [vmem:[#allocation7] ss:$8 sps:$4 sm:$0xff]   ;;  %v4255_v5 = vld [vmem:[#allocation7 + $0x14] ss:$8 sps:$4 sm:$0xff]  }
  0xd6   : > { %527 = vmatprep.subr.bf16.mxu0 %v4252_v3  ;;  %v4257_v13 = vld [vmem:[#allocation7 + $0x10] ss:$8 sps:$4 sm:$0xff]   ;;  %v496_v14 = vld [vmem:[%s5116_s26 + $0x8] sm:$0xff]  ;;  %v495_v18 = vld [vmem:[%s5116_s26] sm:$0xff]  ;;  %v470_v33 = vshrl.u32 %v469_v31, 7  ;;  %vm698_vm1 = vcmask 261120  }
  0xd7   : > { %451 = vadd.xlane.f32.xlu0 %v450_v2  ;;  %528 = vmatpush1.bf16.xpose.msra.mxu0 %v4254_v4  ;;  %v498_v15 = vld [vmem:[%s5116_s26 + $0x18] sm:$0xff]  ;;  %v4260_v17 = vld [vmem:[#allocation10 + $0x4] ss:$8 sps:$4 sm:$0xff]   ;;  %v497_v19 = vld [vmem:[%s5116_s26 + $0x10] sm:$0xff]  ;;  %vm776_vm2 = vcmask 1043456   ;;  %vm748_vm3 = vcmask 64512  }
  0xd8   : > { %529 = vmatprep.subr.bf16.mxu0 %v4255_v5  ;;  %v5136_v16 = vpack.c.bf16 %v498_v15, %v496_v14  ;;  %v4258_v20 = vld [vmem:[#allocation10] ss:$8 sps:$4 sm:$0xff]   ;;  %v5140_v21 = vpack.c.bf16 %v497_v19, %v495_v18  ;;  %v4261_v22 = vld [vmem:[#allocation8 + $0x4] ss:$8 sps:$4 sm:$0xff]   ;;  %v4266_v24 = vld [vmem:[#allocation10 + $0x14] ss:$8 sps:$4 sm:$0xff]  }
  0xd9   : > { %v4263_v23 = vld [vmem:[#allocation8] ss:$8 sps:$4 sm:$0xff]   ;;  %592 = vmatprep.subr.bf16.mxu1 %v4261_v22  ;;  %v4264_v25 = vld [vmem:[#allocation10 + $0x10] ss:$8 sps:$4 sm:$0xff]   ;;  %v4267_v26 = vld [vmem:[#allocation8 + $0x14] ss:$8 sps:$4 sm:$0xff]  }
  0xda   : > { %559 = vmatprep.mubr.bf16.mxu0 %v5136_v16  ;;  %593 = vmatpush1.bf16.xpose.msra.mxu1 %v4263_v23  ;;  %v4269_v27 = vld [vmem:[#allocation8 + $0x10] ss:$8 sps:$4 sm:$0xff]   ;;  %v4272_v28 = vld [vmem:[#allocation7 + $0x24] ss:$8 sps:$4 sm:$0xff]   ;;  %v5144_v34 = vsub.s32 0, %v470_v33  ;;  %v5146_v35 = vsub.s32 1, %v470_v33 }
  0xdb   : > { %594 = vmatprep.subr.bf16.mxu1 %v4267_v26  ;;  %v467_v36 = vld [vmem:[%s5438_s2] sm:$0x3]  ;;  %v4275_v52 = vld [vmem:[#allocation7 + $0x34] ss:$8 sps:$4 sm:$0xff]   ;;  %v4273_v53 = vld [vmem:[#allocation7 + $0x30] ss:$8 sps:$4 sm:$0xff]  }
  0xdc   : > { %v481_v37 = vld [vmem:[%s5439_s3] sm:$0x3]  ;;  %v472_v38 = vrot.slane %v467_v36, %v5144_v34  ;;  %v476_v39 = vrot.slane %v467_v36, %v5146_v35  ;;  %v4278_v54 = vld [vmem:[#allocation10 + $0x24] ss:$8 sps:$4 sm:$0xff]   ;;  %v4281_v56 = vld [vmem:[#allocation10 + $0x34] ss:$8 sps:$4 sm:$0xff]  }
  0xdd   : > { %v486_v41 = vrot.slane %v481_v37, %v5144_v34  ;;  %v490_v42 = vrot.slane %v481_v37, %v5146_v35  ;;  %v4270_v51 = vld [vmem:[#allocation7 + $0x20] ss:$8 sps:$4 sm:$0xff]   ;;  %v4279_v57 = vld [vmem:[#allocation10 + $0x30] ss:$8 sps:$4 sm:$0xff]   ;;  %s446_s4 = scalar_lea.vmem [#allocation13], %s3829_s16  ;;  %s3994_s5 = sshll.u32 %s4853_s15, 9 }
  0xde   : > { %v4276_v55 = vld [vmem:[#allocation10 + $0x20] ss:$8 sps:$4 sm:$0xff]   ;;  %s3680_s6 = sshll.u32 %s446_s4, 4  ;;  %s5476_s24 = sld [smem:[#allocation24_spill]]  ;;  %s5386_s6 = int_to_ptr.vmem [resolvable:$true] %s3680_s6 }
  0xdf   : > { %530 = vmatpush1.bf16.xpose.msra.mxu0 %v4257_v13  ;;  %s3667_s15 = scalar_lea.sflag [#allocation4], %s5104_s20  ;;  %s4682_s16 = scalar_lea.vmem %s5386_s6, 512 }
  0xe0   : > { %656 = vmatprep.subr.bf16.mxu0 %v4260_v17  ;;  %p4683_p6 = scmp.ne.s32.totalorder %s5386_s6, %s4682_s16  ;;  %p5477_p2 = scmp.ne.s32.totalorder %s5464_s23, 0 }
  0xe1   : > { %s4779_s22 = smov [#allocation13]  }
  0xe2   : > { %595 = vmatpush1.bf16.xpose.msra.mxu1 %v4269_v27  ;;  %p4684_p4 = pnand %p4683_p6, %p5477_p2  ;;  %s4686_s26 = sshll.u32 %s4779_s22, 4  ;;  %s4687_s26 = int_to_ptr.vmem [resolvable:$false] %s4686_s26 }
  0xe3   : > { %4027 = vmatprep.subr.bf16.mxu1 %v4776_v63  ;;  %s4688_s17 = scalar_lea.vmem %s4687_s26, 1024  ;;  %p4689_p5 = scmp.lt.s32.totalorder %s5386_s6, %s4687_s26 }
  0xe4   : > { %s5392_s0 = scalar_lea.hbm %s5476_s24, %s3994_s5  ;;  %p4685_p10 = pneg %p4684_p4 }
  0xe5   : > { %p4690_p7 = scmp.lt.s32.totalorder %s4688_s17, %s4682_s16 }
  0xe6   : > { %560 = vmatmul.mubr.bf16.vlgmr.msra.gmra.mrb[0].mxu0 %v5140_v21 }
  0xe7   : > { %657 = vmatpush1.bf16.xpose.msra.mxu0 %v4258_v20  ;;  %p4691_p9 = por %p4690_p7, %p4689_p5 }
  0xe8   : > { %658 = vmatprep.subr.bf16.mxu0 %v4266_v24 }
  0xe9   : > { %p4692_p1 = pnand %p4691_p9, %p4685_p10 }
  0xef   : > { %659 = vmatpush1.bf16.xpose.msra.mxu0 %v4264_v25 }
  0xf0   : > { %851 = vmatprep.subr.bf16.mxu0 %v4272_v28 }
 0x164   : > { %v452_v6 = vpop.xlane.xlu0 %451 }
 0x165   : > { %v454_v7 = vmul.f32 0.00390625, %v452_v6 }
 0x167   : > { %v455_v8 = vsub.f32 %v448_v0, %v454_v7  ;;  %v456_v9 = vsub.f32 %v449_v1, %v454_v7 }
 0x169   : > { %v457_v10 = vmul.f32 %v455_v8, %v455_v8  ;;  %v458_v11 = vmul.f32 %v456_v9, %v456_v9 }
 0x16b   : > { %v459_v12 = vadd.f32 %v458_v11, %v457_v10 }
 0x16d   : > { %460 = vadd.xlane.f32.xlu0 %v459_v12 }
 0x1b9   : > { %v561_v58 = vpop.f32.mrb[0].mxu0 }
 0x1ba   : > { %v563_v59 = vpop.f32.mrb[1].mxu0 }
 0x1bb   : > { %v564_v60 = vpop.f32.mrb[2].mxu0  ;;  %v4285_v59 = vld [vmem:[#allocation8 + $0x30] ss:$8 sps:$4 sm:$0xff]  }
 0x1bc   : > { %v696_v61 = vpack.c.bf16 %v564_v60, %v561_v58  ;;  %v566_v62 = vpop.f32.mrb[3].mxu0  ;;  %v4287_v58 = vld [vmem:[#allocation8 + $0x34] ss:$8 sps:$4 sm:$0xff]   ;;  %v4296_v60 = vld [vmem:[#allocation8 + $0x44] ss:$8 sps:$4 sm:$0xff]  }
 0x1fa   : > { %v461_v29 = vpop.xlane.xlu0 %460 }
 0x1fb   : > { %v462_v30 = vmul.f32 0.00390625, %v461_v29 }
 0x1fd   : > { %v463_v32 = vadd.f32 1e-05, %v462_v30 }
 0x1ff   : > { %4444 = vrsqrt.f32 %v463_v32 }
 0x209   : > { %v4445_v40 = vpop.eup %4444 }
 0x20a   : > { %v465_v43 = vmul.f32 %v4445_v40, %v455_v8  ;;  %v466_v44 = vmul.f32 %v4445_v40, %v456_v9 }
 0x20c   : > { %v479_v45 = vmul.f32 %v472_v38, %v465_v43  ;;  %v480_v46 = vmul.f32 %v476_v39, %v466_v44  ;;  %v4284_v43 = vld [vmem:[#allocation8 + $0x24] ss:$8 sps:$4 sm:$0xff]   ;;  %v4288_v44 = vld [vmem:[#allocation11] ss:$8 sps:$4 sm:$0xff]  }
 0x20e   : > { %v493_v47 = vadd.f32 %v486_v41, %v479_v45  ;;  %v494_v48 = vadd.f32 %v490_v42, %v480_v46  ;;  %v4290_v45 = vld [vmem:[#allocation11 + $0x4] ss:$8 sps:$4 sm:$0xff]   ;;  %v4293_v46 = vld [vmem:[#allocation11 + $0x14] ss:$8 sps:$4 sm:$0xff]  }
 0x210   : > { %v5158_v49 = vpack.c.bf16 %v493_v47, %v493_v47  ;;  %v5160_v50 = vpack.c.bf16 %v494_v48, %v494_v48  ;;  %v4291_v47 = vld [vmem:[#allocation11 + $0x10] ss:$8 sps:$4 sm:$0xff]  }
 0x212   : > { %624 = vmatprep.mubr.bf16.mxu1 %v5160_v50  ;;  %688 = vmatprep.mubr.bf16.mxu0 %v5160_v50 }
 0x213   : > { %625 = vmatmul.mubr.bf16.vlgmr.msra.gmra.mrb[0].mxu1 %v5158_v49  ;;  %689 = vmatmul.mubr.bf16.vlgmr.msra.gmra.mrb[4].mxu0 %v5158_v49 }
 0x214   : > { %852 = vmatpush1.bf16.xpose.msra.mxu0 %v4270_v51  ;;  %883 = vmatprep.mubr.bf16.mxu0 %v5136_v16 }
 0x215   : > { %853 = vmatprep.subr.bf16.mxu0 %v4275_v52  ;;  %4029 = vmatprep.mubr.msk.bf16.mxu1 %vm4777_vm0, %v4776_v63 }
 0x21c   : > { %854 = vmatpush1.bf16.xpose.msra.mxu0 %v4273_v53 }
 0x21d   : > { %982 = vmatprep.subr.bf16.mxu0 %v4278_v54 }
 0x223   : > { %884 = vmatmul.mubr.bf16.vlgmr.msra.gmra.mrb[8].mxu0 %v5140_v21 }
 0x224   : > { %983 = vmatpush1.bf16.xpose.msra.mxu0 %v4276_v55  ;;  %1014 = vmatprep.mubr.bf16.mxu0 %v5160_v50 }
 0x225   : > { %984 = vmatprep.subr.bf16.mxu0 %v4281_v56  ;;  %v4282_v56 = vld [vmem:[#allocation8 + $0x20] ss:$8 sps:$4 sm:$0xff]  }
 0x22c   : > { %985 = vmatpush1.bf16.xpose.msra.mxu0 %v4279_v57 }
 0x22d   : > { %1239 = vmatprep.subr.bf16.mxu0 %v4290_v45 }
 0x233   : > { %1015 = vmatmul.mubr.bf16.vlgmr.msra.gmra.mrb[12].mxu0 %v5158_v49 }
 0x234   : > { %1240 = vmatpush1.bf16.msra.mxu0 %v4288_v44 }
 0x235   : > { %1241 = vmatprep.subr.bf16.mxu0 %v4293_v46 }
 0x238   : > { %1242 = vmatpush1.bf16.msra.mxu0 %v4291_v47 }
 0x239   : > { %1373 = vmatprep.subr.bf16.mxu0 %v4296_v60  ;;  %v4306_v60 = vld [vmem:[#allocation7 + $0x40] ss:$8 sps:$4 sm:$0xff]  }
 0x2e6   : > { %v626_v0 = vpop.f32.mrb[0].mxu1  ;;  %v690_v1 = vpop.f32.mrb[4].mxu0 }
 0x2e7   : > { %v697_v2 = vpack.c.bf16 %v626_v0, %v626_v0  ;;  %v628_v3 = vpop.f32.mrb[1].mxu1  ;;  %v692_v4 = vpop.f32.mrb[5].mxu0  ;;  %v772_v10 = vpack.c.bf16 %v690_v1, %v690_v1 }
 0x2e8   : > { %v629_v5 = vpop.f32.mrb[2].mxu1  ;;  %v693_v6 = vpop.f32.mrb[6].mxu0 }
 0x2e9   : > { %v703_v7 = vsel %vm698_vm1, %v697_v2, 0  ;;  %v630_v8 = vpop.f32.mrb[3].mxu1  ;;  %v694_v9 = vpop.f32.mrb[7].mxu0  ;;  %v778_v11 = vsel %vm776_vm2, %v772_v10, 0  ;;  %v4294_v2 = vld [vmem:[#allocation8 + $0x40] ss:$8 sps:$4 sm:$0xff]  }
 0x2ea   : > { %4028 = vmatpush3.bf16.xpose.msra.mxu1 %v703_v7  ;;  %v4299_v5 = vld [vmem:[#allocation8 + $0x54] ss:$8 sps:$4 sm:$0xff]   ;;  %v4297_v6 = vld [vmem:[#allocation8 + $0x50] ss:$8 sps:$4 sm:$0xff]  }
 0x2eb   : > { %4033 = vmatprep.subr.bf16.mxu1 %v4776_v63 }
 0x2f1   : > { %4030 = vmatmul.mubr.msk.bf16.vlgmr.msra.gmra.mrb[4].mxu1 %vm698_vm1, %v696_v61  ;;  %v4778_v61 = vmov 0  }
 0x2f2   : > { %4034 = vmatpush3.bf16.msra.mxu1 %v778_v11  ;;  %4035 = vmatprep.mubr.msk.bf16.mxu1 %vm4777_vm0, %v4776_v63 }
 0x2f3   : > { %917 = vmatprep.subr.bf16.mxu1 %v4284_v43  ;;  %1271 = vmatprep.mubr.bf16.mxu0 %v4778_v61  ;;  %v4302_v43 = vld [vmem:[#allocation11 + $0x24] ss:$8 sps:$4 sm:$0xff]  }
 0x2f6   : > { %v5179_v12 = vpop.f32.mrb[8].mxu0 }
 0x2f7   : > { %v887_v13 = vpop.f32.mrb[9].mxu0 }
 0x2f8   : > { %v5181_v14 = vpop.f32.mrb[10].mxu0 }
 0x2f9   : > { %v1022_v15 = vpack.c.bf16 %v5181_v14, %v5179_v12  ;;  %v890_v17 = vpop.f32.mrb[11].mxu0 }
 0x306   : > { %v5185_v18 = vpop.f32.mrb[12].mxu0 }
 0x307   : > { %v1018_v19 = vpop.f32.mrb[13].mxu0  ;;  %v1096_v17 = vpack.c.bf16 %v5185_v18, %v5185_v18 }
 0x308   : > { %v1019_v20 = vpop.f32.mrb[14].mxu0 }
 0x309   : > { %v1020_v22 = vpop.f32.mrb[15].mxu0  ;;  %v1101_v19 = vsel %vm776_vm2, %v1096_v17, 0 }
 0x3c4   : > { %v739_v23 = vpop.f32.mrb[4].mxu1 }
 0x3c5   : > { %v746_v24 = vmul.f32 0.125, %v739_v23  ;;  %v4031_v25 = vpop.f32.mrb[5].mxu1 }
 0x3c6   : > { %v742_v26 = vpop.f32.mrb[6].mxu1 }
 0x3c7   : > { %v747_v27 = vmul.f32 0.125, %v742_v26  ;;  %v4032_v28 = vpop.f32.mrb[7].mxu1  ;;  %v749_v29 = vsel %vm748_vm3, %v746_v24, -inf }
 0x3c8   : > { %750 = vmax.xlane.f32.xlu1 %v749_v29 }
 0x3c9   : > { %v752_v30 = vsel %vm748_vm3, %v747_v27, -inf }
 0x3cc   : > { %753 = vmax.xlane.f32.xlu1 %v752_v30 }
 0x455   : > { %v751_v31 = vpop.xlane.xlu1 %750 }
 0x456   : > { %v755_v32 = vsub.f32 %v746_v24, %v751_v31 }
 0x458   : > { %v757_v33 = vmul.f32 1.442695, %v755_v32 }
 0x459   : > { %v754_v36 = vpop.xlane.xlu1 %753 }
 0x45a   : > { %4446 = vpow2.f32 %v757_v33  ;;  %v756_v37 = vsub.f32 %v747_v27, %v754_v36 }
 0x45c   : > { %v759_v38 = vmul.f32 1.442695, %v756_v37 }
 0x45e   : > { %4448 = vpow2.f32 %v759_v38 }
 0x464   : > { %v4447_v39 = vpop.eup %4446 }
 0x465   : > { %v761_v40 = vsel %vm748_vm3, %v4447_v39, 0.0 }
 0x466   : > { %762 = vadd.xlane.f32.xlu0 %v761_v40 }
 0x468   : > { %v4449_v41 = vpop.eup %4448 }
 0x469   : > { %v764_v42 = vsel %vm748_vm3, %v4449_v41, 0.0 }
 0x46a   : > { %765 = vadd.xlane.f32.xlu1 %v764_v42 }
 0x4f3   : > { %v763_v48 = vpop.xlane.xlu0 %762 }
 0x4f4   : > { %4450 = vrcp.f32 %v763_v48 }
 0x4f7   : > { %v766_v51 = vpop.xlane.xlu1 %765 }
 0x4f8   : > { %4452 = vrcp.f32 %v766_v51 }
 0x4fe   : > { %v4451_v52 = vpop.eup %4450 }
 0x4ff   : > { %v769_v54 = vmul.f32 %v4451_v52, %v4447_v39  ;;  %v4300_v52 = vld [vmem:[#allocation11 + $0x20] ss:$8 sps:$4 sm:$0xff]  }
 0x502   : > { %v4453_v53 = vpop.eup %4452 }
 0x503   : > { %v770_v55 = vmul.f32 %v4453_v53, %v4449_v41 }
 0x505   : > { %v771_v57 = vpack.c.bf16 %v770_v55, %v769_v54  ;;  %v4305_v54 = vld [vmem:[#allocation11 + $0x34] ss:$8 sps:$4 sm:$0xff]   ;;  %v4303_v55 = vld [vmem:[#allocation11 + $0x30] ss:$8 sps:$4 sm:$0xff]  }
 0x507   : > { %4036 = vmatmul.mubr.msk.bf16.vlgmr.msra.gmra.mrb[8].mxu1 %vm748_vm3, %v771_v57 }
 0x508   : > { %918 = vmatpush1.bf16.xpose.msra.mxu1 %v4282_v56  ;;  %949 = vmatprep.mubr.bf16.mxu1 %v5160_v50  ;;  %v4308_v56 = vld [vmem:[#allocation7 + $0x44] ss:$8 sps:$4 sm:$0xff]  }
 0x509   : > { %919 = vmatprep.subr.bf16.mxu1 %v4287_v58 }
 0x510   : > { %920 = vmatpush1.bf16.xpose.msra.mxu1 %v4285_v59 }
 0x511   : > { %4039 = vmatprep.subr.bf16.mxu1 %v4776_v63 }
 0x517   : > { %950 = vmatmul.mubr.bf16.vlgmr.msra.gmra.mrb[12].mxu1 %v5158_v49 }
 0x518   : > { %4041 = vmatprep.mubr.msk.bf16.mxu1 %vm4777_vm0, %v4776_v63 }
 0x5da   : > { %v814_v62 = vpop.f32.mrb[8].mxu1 }
 0x5db   : > { %v4037_v0 = vpop.f32.mrb[9].mxu1 }
 0x5dc   : > { %v817_v1 = vpop.f32.mrb[10].mxu1 }
 0x5dd   : > { %v821_v3 = vpack.c.bf16 %v817_v1, %v814_v62  ;;  %v4038_v4 = vpop.f32.mrb[11].mxu1  ;;  %v4311_v1 = vld [vmem:[#allocation7 + $0x54] ss:$8 sps:$4 sm:$0xff]  }
 0x5de   : > { %v4312_v4 = vld [vmem:[#allocation10 + $0x40] ss:$8 sps:$4 sm:$0xff]  }
 0x5df   : > { %3872 = vmatmul.mubr.msk.bf16.vlgmr.msra.gmra.mrb[16].mxu0 %vm698_vm1, %v821_v3  ;;  %v4314_v3 = vld [vmem:[#allocation10 + $0x44] ss:$8 sps:$4 sm:$0xff]  }
 0x5e0   : > { %1374 = vmatpush1.bf16.xpose.msra.mxu0 %v4294_v2  ;;  %1405 = vmatprep.mubr.bf16.mxu0 %v5160_v50  ;;  %v4309_v2 = vld [vmem:[#allocation7 + $0x50] ss:$8 sps:$4 sm:$0xff]  }
 0x5e1   : > { %1375 = vmatprep.subr.bf16.mxu0 %v4299_v5  ;;  %v4317_v5 = vld [vmem:[#allocation10 + $0x54] ss:$8 sps:$4 sm:$0xff]  }
 0x5e8   : > { %1376 = vmatpush1.bf16.xpose.msra.mxu0 %v4297_v6  ;;  %v4315_v6 = vld [vmem:[#allocation10 + $0x50] ss:$8 sps:$4 sm:$0xff]  }
 0x5e9   : > { %4051 = vmatprep.subr.bf16.mxu0 %v4776_v63 }
 0x5ea   : > { %v951_v7 = vpop.f32.mrb[12].mxu1 }
 0x5eb   : > { %v1023_v8 = vpack.c.bf16 %v951_v7, %v951_v7  ;;  %v953_v9 = vpop.f32.mrb[13].mxu1 }
 0x5ec   : > { %v954_v10 = vpop.f32.mrb[14].mxu1 }
 0x5ed   : > { %v1028_v11 = vsel %vm698_vm1, %v1023_v8, 0  ;;  %v955_v13 = vpop.f32.mrb[15].mxu1 }
 0x5ee   : > { %4040 = vmatpush3.bf16.xpose.msra.mxu1 %v1028_v11 }
 0x5ef   : > { %1406 = vmatmul.mubr.bf16.vlgmr.msra.gmra.mrb[20].mxu0 %v5158_v49  ;;  %4045 = vmatprep.subr.bf16.mxu1 %v4776_v63 }
 0x5f0   : > { %4053 = vmatprep.mubr.msk.bf16.mxu0 %vm4777_vm0, %v4776_v63 }
 0x5f5   : > { %4042 = vmatmul.mubr.msk.bf16.vlgmr.msra.gmra.mrb[16].mxu1 %vm698_vm1, %v1022_v15 }
 0x5f6   : > { %4046 = vmatpush3.bf16.msra.mxu1 %v1101_v19  ;;  %4047 = vmatprep.mubr.msk.bf16.mxu1 %vm4777_vm0, %v4776_v63 }
 0x5f7   : > { %1173 = vmatprep.subr.bf16.mxu1 %v4302_v43 }
 0x6c2   : > { %v1407_v20 = vpop.f32.mrb[20].mxu0 }
 0x6c3   : > { %v1479_v22 = vpack.c.bf16 %v1407_v20, %v1407_v20  ;;  %v1409_v23 = vpop.f32.mrb[21].mxu0 }
 0x6c4   : > { %v1410_v24 = vpop.f32.mrb[22].mxu0 }
 0x6c5   : > { %v1484_v25 = vsel %vm698_vm1, %v1479_v22, 0  ;;  %v1411_v26 = vpop.f32.mrb[23].mxu0 }
 0x6c6   : > { %4052 = vmatpush3.bf16.xpose.msra.mxu0 %v1484_v25 }
 0x6c8   : > { %v1064_v18 = vpop.f32.mrb[16].mxu1 }
 0x6c9   : > { %v1071_v27 = vmul.f32 0.125, %v1064_v18  ;;  %v4043_v28 = vpop.f32.mrb[17].mxu1 }
 0x6ca   : > { %v1067_v29 = vpop.f32.mrb[18].mxu1 }
 0x6cb   : > { %v1072_v30 = vmul.f32 0.125, %v1067_v29  ;;  %v4044_v12 = vpop.f32.mrb[19].mxu1  ;;  %v1073_v14 = vsel %vm748_vm3, %v1071_v27, -inf }
 0x6cc   : > { %1074 = vmax.xlane.f32.xlu0 %v1073_v14 }
 0x6cd   : > { %v1076_v15 = vsel %vm748_vm3, %v1072_v30, -inf }
 0x6ce   : > { %1077 = vmax.xlane.f32.xlu1 %v1076_v15 }
 0x759   : > { %v1075_v31 = vpop.xlane.xlu0 %1074 }
 0x75a   : > { %v1079_v32 = vsub.f32 %v1071_v27, %v1075_v31 }
 0x75b   : > { %v1078_v33 = vpop.xlane.xlu1 %1077 }
 0x75c   : > { %v1081_v36 = vmul.f32 1.442695, %v1079_v32  ;;  %v1080_v37 = vsub.f32 %v1072_v30, %v1078_v33 }
 0x75e   : > { %4454 = vpow2.f32 %v1081_v36  ;;  %v1083_v38 = vmul.f32 1.442695, %v1080_v37 }
 0x760   : > { %4456 = vpow2.f32 %v1083_v38 }
 0x768   : > { %v4455_v39 = vpop.eup %4454 }
 0x769   : > { %v1085_v40 = vsel %vm748_vm3, %v4455_v39, 0.0 }
 0x76a   : > { %v4457_v41 = vpop.eup %4456  ;;  %1086 = vadd.xlane.f32.xlu0 %v1085_v40 }
 0x76b   : > { %v1088_v42 = vsel %vm748_vm3, %v4457_v41, 0.0 }
 0x76c   : > { %1089 = vadd.xlane.f32.xlu1 %v1088_v42 }
 0x7f7   : > { %v1087_v44 = vpop.xlane.xlu0 %1086 }
 0x7f8   : > { %4458 = vrcp.f32 %v1087_v44  ;;  %v4320_v44 = vld [vmem:[#allocation7 + $0x64] ss:$8 sps:$4 sm:$0xff]  }
 0x7f9   : > { %v1090_v45 = vpop.xlane.xlu1 %1089 }
 0x7fa   : > { %4460 = vrcp.f32 %v1090_v45  ;;  %v4342_v45 = vld [vmem:[#allocation11 + $0x40] ss:$8 sps:$4 sm:$0xff]  }
 0x802   : > { %v4459_v46 = vpop.eup %4458 }
 0x803   : > { %v1093_v48 = vmul.f32 %v4459_v46, %v4455_v39  ;;  %v4344_v46 = vld [vmem:[#allocation11 + $0x44] ss:$8 sps:$4 sm:$0xff]  }
 0x804   : > { %v4461_v47 = vpop.eup %4460  ;;  %1629 = vmatprep.subr.bf16.mxu0 %v4344_v46 }
 0x805   : > { %v1094_v51 = vmul.f32 %v4461_v47, %v4457_v41  ;;  %v4347_v47 = vld [vmem:[#allocation11 + $0x54] ss:$8 sps:$4 sm:$0xff]  }
 0x807   : > { %v1095_v53 = vpack.c.bf16 %v1094_v51, %v1093_v48  ;;  %v4345_v48 = vld [vmem:[#allocation11 + $0x50] ss:$8 sps:$4 sm:$0xff]  }
 0x809   : > { %4048 = vmatmul.mubr.msk.bf16.vlgmr.msra.gmra.mrb[20].mxu1 %vm748_vm3, %v1095_v53 }
 0x80a   : > { %1174 = vmatpush1.bf16.msra.mxu1 %v4300_v52  ;;  %1205 = vmatprep.mubr.bf16.mxu1 %v4778_v61 }
 0x80b   : > { %1175 = vmatprep.subr.bf16.mxu1 %v4305_v54 }
 0x80e   : > { %1176 = vmatpush1.bf16.msra.mxu1 %v4303_v55 }
 0x80f   : > { %1307 = vmatprep.subr.bf16.mxu1 %v4308_v56 }
 0x8dc   : > { %v1137_v57 = vpop.f32.mrb[20].mxu1 }
 0x8dd   : > { %v4049_v58 = vpop.f32.mrb[21].mxu1 }
 0x8de   : > { %v1140_v59 = vpop.f32.mrb[22].mxu1 }
 0x8df   : > { %v1144_v62 = vpack.c.bf16 %v1140_v59, %v1137_v57  ;;  %v4050_v0 = vpop.f32.mrb[23].mxu1  ;;  %v4318_v57 = vld [vmem:[#allocation7 + $0x60] ss:$8 sps:$4 sm:$0xff]   ;;  %v4323_v59 = vld [vmem:[#allocation7 + $0x74] ss:$8 sps:$4 sm:$0xff]  }
 0x8e0   : > { %v4324_v0 = vld [vmem:[#allocation10 + $0x60] ss:$8 sps:$4 sm:$0xff]  }
 0x8e1   : > { %3867 = vmatmul.mubr.msk.bf16.vlgmr.msra.gmra.mrb[24].mxu1 %vm698_vm1, %v1144_v62  ;;  %v4326_v62 = vld [vmem:[#allocation10 + $0x64] ss:$8 sps:$4 sm:$0xff]  }
 0x8e2   : > { %1308 = vmatpush1.bf16.xpose.msra.mxu1 %v4306_v60  ;;  %1339 = vmatprep.mubr.bf16.mxu1 %v5136_v16  ;;  %v4321_v60 = vld [vmem:[#allocation7 + $0x70] ss:$8 sps:$4 sm:$0xff]  }
 0x8e3   : > { %1309 = vmatprep.subr.bf16.mxu1 %v4311_v1  ;;  %v4329_v1 = vld [vmem:[#allocation10 + $0x74] ss:$8 sps:$4 sm:$0xff]  }
 0x8ea   : > { %1310 = vmatpush1.bf16.xpose.msra.mxu1 %v4309_v2  ;;  %v4327_v2 = vld [vmem:[#allocation10 + $0x70] ss:$8 sps:$4 sm:$0xff]  }
 0x8eb   : > { %1438 = vmatprep.subr.bf16.mxu1 %v4314_v3  ;;  %v4332_v3 = vld [vmem:[#allocation7 + $0x84] ss:$8 sps:$4 sm:$0xff]  }
 0x8f1   : > { %1340 = vmatmul.mubr.bf16.vlgmr.msra.gmra.mrb[28].mxu1 %v5140_v21 }
 0x8f2   : > { %1439 = vmatpush1.bf16.xpose.msra.mxu1 %v4312_v4  ;;  %1470 = vmatprep.mubr.bf16.mxu1 %v5160_v50  ;;  %v4330_v4 = vld [vmem:[#allocation7 + $0x80] ss:$8 sps:$4 sm:$0xff]  }
 0x8f3   : > { %1440 = vmatprep.subr.bf16.mxu1 %v4317_v5  ;;  %v4335_v5 = vld [vmem:[#allocation7 + $0x94] ss:$8 sps:$4 sm:$0xff]  }
 0x8fa   : > { %1441 = vmatpush1.bf16.xpose.msra.mxu1 %v4315_v6  ;;  %v4333_v6 = vld [vmem:[#allocation7 + $0x90] ss:$8 sps:$4 sm:$0xff]  }
 0x8fb   : > { %4057 = vmatprep.subr.bf16.mxu1 %v4776_v63 }
 0x901   : > { %1471 = vmatmul.mubr.bf16.vlgmr.msra.gmra.mrb[32].mxu1 %v5158_v49 }
 0x902   : > { %4059 = vmatprep.mubr.msk.bf16.mxu1 %vm4777_vm0, %v4776_v63 }
 0x9b4   : > { %v5230_v7 = vpop.f32.mrb[24].mxu1 }
 0x9b5   : > { %v5232_v8 = vpop.f32.mrb[25].mxu1 }
 0x9b6   : > { %v5234_v9 = vpop.f32.mrb[26].mxu1 }
 0x9b7   : > { %v5236_v10 = vpop.f32.mrb[27].mxu1 }
 0x9c4   : > { %v1341_v11 = vpop.f32.mrb[28].mxu1 }
 0x9c5   : > { %v1343_v13 = vpop.f32.mrb[29].mxu1 }
 0x9c6   : > { %v1344_v17 = vpop.f32.mrb[30].mxu1  ;;  %v4336_v13 = vld [vmem:[#allocation10 + $0x80] ss:$8 sps:$4 sm:$0xff]  }
 0x9c7   : > { %v1478_v19 = vpack.c.bf16 %v1344_v17, %v1341_v11  ;;  %v1346_v20 = vpop.f32.mrb[31].mxu1  ;;  %v4338_v11 = vld [vmem:[#allocation10 + $0x84] ss:$8 sps:$4 sm:$0xff]   ;;  %v4341_v17 = vld [vmem:[#allocation10 + $0x94] ss:$8 sps:$4 sm:$0xff]  }
 0x9c8   : > { %v4350_v20 = vld [vmem:[#allocation8 + $0x64] ss:$8 sps:$4 sm:$0xff]  }
 0x9c9   : > { %4054 = vmatmul.mubr.msk.bf16.vlgmr.msra.gmra.mrb[24].mxu0 %vm698_vm1, %v1478_v19  ;;  %v4339_v19 = vld [vmem:[#allocation10 + $0x90] ss:$8 sps:$4 sm:$0xff]  }
 0x9ca   : > { %1661 = vmatprep.mubr.bf16.mxu0 %v4778_v61  ;;  %1630 = vmatpush1.bf16.msra.mxu0 %v4342_v45 }
 0x9cb   : > { %1631 = vmatprep.subr.bf16.mxu0 %v4347_v47 }
 0x9ce   : > { %1632 = vmatpush1.bf16.msra.mxu0 %v4345_v48 }
 0x9cf   : > { %1767 = vmatprep.subr.bf16.mxu0 %v4350_v20 }
 0x9d4   : > { %v1472_v22 = vpop.f32.mrb[32].mxu1 }
 0x9d5   : > { %v1552_v23 = vpack.c.bf16 %v1472_v22, %v1472_v22  ;;  %v1474_v24 = vpop.f32.mrb[33].mxu1 }
 0x9d6   : > { %v1475_v25 = vpop.f32.mrb[34].mxu1 }
 0x9d7   : > { %v1557_v26 = vsel %vm776_vm2, %v1552_v23, 0  ;;  %v1476_v18 = vpop.f32.mrb[35].mxu1  ;;  %v4348_v25 = vld [vmem:[#allocation8 + $0x60] ss:$8 sps:$4 sm:$0xff]  }
 0x9d8   : > { %4058 = vmatpush3.bf16.msra.mxu1 %v1557_v26 }
 0x9d9   : > { %1701 = vmatprep.subr.bf16.mxu1 %v4320_v44 }
 0xa9c   : > { %v1520_v27 = vpop.f32.mrb[24].mxu0 }
 0xa9d   : > { %v1527_v28 = vmul.f32 0.125, %v1520_v27  ;;  %v4055_v29 = vpop.f32.mrb[25].mxu0  ;;  %v4353_v27 = vld [vmem:[#allocation8 + $0x74] ss:$8 sps:$4 sm:$0xff]  }
 0xa9e   : > { %v1523_v30 = vpop.f32.mrb[26].mxu0 }
 0xa9f   : > { %v1528_v12 = vmul.f32 0.125, %v1523_v30  ;;  %v4056_v14 = vpop.f32.mrb[27].mxu0  ;;  %v1529_v15 = vsel %vm748_vm3, %v1527_v28, -inf }
 0xaa0   : > { %1530 = vmax.xlane.f32.xlu0 %v1529_v15 }
 0xaa1   : > { %v1532_v31 = vsel %vm748_vm3, %v1528_v12, -inf }
 0xaa2   : > { %1533 = vmax.xlane.f32.xlu1 %v1532_v31 }
 0xb2d   : > { %v1531_v32 = vpop.xlane.xlu0 %1530 }
 0xb2e   : > { %v1535_v33 = vsub.f32 %v1527_v28, %v1531_v32  ;;  %v4351_v28 = vld [vmem:[#allocation8 + $0x70] ss:$8 sps:$4 sm:$0xff]  }
 0xb2f   : > { %v1534_v36 = vpop.xlane.xlu1 %1533 }
 0xb30   : > { %v1537_v37 = vmul.f32 1.442695, %v1535_v33  ;;  %v1536_v38 = vsub.f32 %v1528_v12, %v1534_v36 }
 0xb32   : > { %4462 = vpow2.f32 %v1537_v37  ;;  %v1539_v39 = vmul.f32 1.442695, %v1536_v38 }
 0xb34   : > { %4464 = vpow2.f32 %v1539_v39 }
 0xb3c   : > { %v4463_v40 = vpop.eup %4462 }
 0xb3d   : > { %v1541_v41 = vsel %vm748_vm3, %v4463_v40, 0.0 }
 0xb3e   : > { %v4465_v42 = vpop.eup %4464  ;;  %1542 = vadd.xlane.f32.xlu0 %v1541_v41 }
 0xb3f   : > { %v1544_v43 = vsel %vm748_vm3, %v4465_v42, 0.0 }
 0xb40   : > { %1545 = vadd.xlane.f32.xlu1 %v1544_v43 }
 0xbcb   : > { %v1543_v51 = vpop.xlane.xlu0 %1542 }
 0xbcc   : > { %4466 = vrcp.f32 %v1543_v51 }
 0xbcd   : > { %v1546_v52 = vpop.xlane.xlu1 %1545 }
 0xbce   : > { %4468 = vrcp.f32 %v1546_v52 }
 0xbd6   : > { %v4467_v53 = vpop.eup %4466 }
 0xbd7   : > { %v1549_v55 = vmul.f32 %v4467_v53, %v4463_v40 }
 0xbd8   : > { %v4469_v54 = vpop.eup %4468 }
 0xbd9   : > { %v1550_v56 = vmul.f32 %v4469_v54, %v4465_v42 }
 0xbdb   : > { %v1551_v58 = vpack.c.bf16 %v1550_v56, %v1549_v55 }
 0xbdd   : > { %4060 = vmatmul.mubr.msk.bf16.vlgmr.msra.gmra.mrb[36].mxu1 %vm748_vm3, %v1551_v58 }
 0xbde   : > { %1702 = vmatpush1.bf16.xpose.msra.mxu1 %v4318_v57  ;;  %1733 = vmatprep.mubr.bf16.mxu1 %v5136_v16 }
 0xbdf   : > { %1703 = vmatprep.subr.bf16.mxu1 %v4323_v59 }
 0xbe6   : > { %1704 = vmatpush1.bf16.xpose.msra.mxu1 %v4321_v60 }
 0xbe7   : > { %1832 = vmatprep.subr.bf16.mxu1 %v4326_v62 }
 0xbed   : > { %1734 = vmatmul.mubr.bf16.vlgmr.msra.gmra.mrb[40].mxu1 %v5140_v21 }
 0xbee   : > { %1833 = vmatpush1.bf16.xpose.msra.mxu1 %v4324_v0  ;;  %1864 = vmatprep.mubr.bf16.mxu1 %v5160_v50 }
 0xbef   : > { %1834 = vmatprep.subr.bf16.mxu1 %v4329_v1 }
 0xbf6   : > { %1835 = vmatpush1.bf16.xpose.msra.mxu1 %v4327_v2 }
 0xbf7   : > { %2095 = vmatprep.subr.bf16.mxu1 %v4332_v3 }
 0xbfd   : > { %1865 = vmatmul.mubr.bf16.vlgmr.msra.gmra.mrb[44].mxu1 %v5158_v49 }
 0xbfe   : > { %2096 = vmatpush1.bf16.xpose.msra.mxu1 %v4330_v4  ;;  %2127 = vmatprep.mubr.bf16.mxu1 %v5136_v16 }
 0xbff   : > { %2097 = vmatprep.subr.bf16.mxu1 %v4335_v5 }
 0xc06   : > { %2098 = vmatpush1.bf16.xpose.msra.mxu1 %v4333_v6 }
 0xc07   : > { %2226 = vmatprep.subr.bf16.mxu1 %v4338_v11 }
 0xc0d   : > { %2128 = vmatmul.mubr.bf16.vlgmr.msra.gmra.mrb[48].mxu1 %v5140_v21 }
 0xc0e   : > { %2227 = vmatpush1.bf16.xpose.msra.mxu1 %v4336_v13  ;;  %2258 = vmatprep.mubr.bf16.mxu1 %v5160_v50 }
 0xc0f   : > { %2228 = vmatprep.subr.bf16.mxu1 %v4341_v17 }
 0xc16   : > { %2229 = vmatpush1.bf16.xpose.msra.mxu1 %v4339_v19 }
 0xc17   : > { %4081 = vmatprep.subr.bf16.mxu1 %v4776_v63 }
 0xc1d   : > { %2259 = vmatmul.mubr.bf16.vlgmr.msra.gmra.mrb[52].mxu1 %v5158_v49 }
 0xc1e   : > { %4083 = vmatprep.mubr.msk.bf16.mxu1 %vm4777_vm0, %v4776_v63 }
 0xcb0   : > { %v1593_v22 = vpop.f32.mrb[36].mxu1 }
 0xcb1   : > { %v4061_v23 = vpop.f32.mrb[37].mxu1 }
 0xcb2   : > { %v1596_v24 = vpop.f32.mrb[38].mxu1 }
 0xcb3   : > { %v1600_v26 = vpack.c.bf16 %v1596_v24, %v1593_v22  ;;  %v4062_v18 = vpop.f32.mrb[39].mxu1  ;;  %v4356_v24 = vld [vmem:[#allocation11 + $0x64] ss:$8 sps:$4 sm:$0xff]  }
 0xcb5   : > { %3891 = vmatmul.mubr.msk.bf16.vlgmr.msra.gmra.mrb[16].mxu0 %vm698_vm1, %v1600_v26 }
 0xcb6   : > { %1768 = vmatpush1.bf16.xpose.msra.mxu0 %v4348_v25  ;;  %1799 = vmatprep.mubr.bf16.mxu0 %v5160_v50 }
 0xcb7   : > { %1769 = vmatprep.subr.bf16.mxu0 %v4353_v27 }
 0xcbe   : > { %1770 = vmatpush1.bf16.xpose.msra.mxu0 %v4351_v28 }
 0xcbf   : > { %4063 = vmatprep.subr.bf16.mxu0 %v4776_v63 }
 0xcc0   : > { %v1735_v29 = vpop.f32.mrb[40].mxu1 }
 0xcc1   : > { %v1737_v30 = vpop.f32.mrb[41].mxu1 }
 0xcc2   : > { %v1738_v12 = vpop.f32.mrb[42].mxu1  ;;  %v4354_v30 = vld [vmem:[#allocation11 + $0x60] ss:$8 sps:$4 sm:$0xff]  }
 0xcc3   : > { %v1872_v14 = vpack.c.bf16 %v1738_v12, %v1735_v29  ;;  %v1740_v15 = vpop.f32.mrb[43].mxu1 }
 0xcc4   : > { %v4357_v15 = vld [vmem:[#allocation11 + $0x70] ss:$8 sps:$4 sm:$0xff]  }
 0xcc5   : > { %1800 = vmatmul.mubr.bf16.vlgmr.msra.gmra.mrb[28].mxu0 %v5158_v49 }
 0xcc6   : > { %4065 = vmatprep.mubr.msk.bf16.mxu0 %vm4777_vm0, %v4776_v63 }
 0xcd0   : > { %v1866_v31 = vpop.f32.mrb[44].mxu1 }
 0xcd1   : > { %v1868_v32 = vpop.f32.mrb[45].mxu1  ;;  %v1946_v56 = vpack.c.bf16 %v1866_v31, %v1866_v31  ;;  %v4362_v31 = vld [vmem:[#allocation8 + $0x84] ss:$8 sps:$4 sm:$0xff]  }
 0xcd2   : > { %v1869_v33 = vpop.f32.mrb[46].mxu1 }
 0xcd3   : > { %v1870_v36 = vpop.f32.mrb[47].mxu1  ;;  %v1951_v57 = vsel %vm776_vm2, %v1946_v56, 0 }
 0xce0   : > { %v5263_v37 = vpop.f32.mrb[48].mxu1 }
 0xce1   : > { %v2131_v38 = vpop.f32.mrb[49].mxu1 }
 0xce2   : > { %v5265_v39 = vpop.f32.mrb[50].mxu1  ;;  %v4360_v38 = vld [vmem:[#allocation8 + $0x80] ss:$8 sps:$4 sm:$0xff]  }
 0xce3   : > { %v2266_v40 = vpack.c.bf16 %v5265_v39, %v5263_v37  ;;  %v2134_v41 = vpop.f32.mrb[51].mxu1 }
 0xcf0   : > { %v2260_v42 = vpop.f32.mrb[52].mxu1 }
 0xcf1   : > { %v2340_v43 = vpack.c.bf16 %v2260_v42, %v2260_v42  ;;  %v2262_v44 = vpop.f32.mrb[53].mxu1 }
 0xcf2   : > { %v2263_v45 = vpop.f32.mrb[54].mxu1  ;;  %v4363_v44 = vld [vmem:[#allocation8 + $0x90] ss:$8 sps:$4 sm:$0xff]  }
 0xcf3   : > { %v2345_v46 = vsel %vm776_vm2, %v2340_v43, 0  ;;  %v2264_v47 = vpop.f32.mrb[55].mxu1  ;;  %v4365_v43 = vld [vmem:[#allocation8 + $0x94] ss:$8 sps:$4 sm:$0xff]  }
 0xcf4   : > { %4082 = vmatpush3.bf16.msra.mxu1 %v2345_v46 }
 0xd98   : > { %v1801_v48 = vpop.f32.mrb[28].mxu0 }
 0xd99   : > { %v1873_v51 = vpack.c.bf16 %v1801_v48, %v1801_v48  ;;  %v1803_v52 = vpop.f32.mrb[29].mxu0 }
 0xd9a   : > { %v1804_v53 = vpop.f32.mrb[30].mxu0 }
 0xd9b   : > { %v1878_v54 = vsel %vm698_vm1, %v1873_v51, 0  ;;  %v1805_v55 = vpop.f32.mrb[31].mxu0 }
 0xd9c   : > { %4064 = vmatpush3.bf16.xpose.msra.mxu0 %v1878_v54 }
 0xd9d   : > { %4069 = vmatprep.subr.bf16.mxu0 %v4776_v63 }
 0xda3   : > { %4066 = vmatmul.mubr.msk.bf16.vlgmr.msra.gmra.mrb[32].mxu0 %vm698_vm1, %v1872_v14  ;;  %v4359_v14 = vld [vmem:[#allocation11 + $0x74] ss:$8 sps:$4 sm:$0xff]  }
 0xda4   : > { %4070 = vmatpush3.bf16.msra.mxu0 %v1951_v57  ;;  %4071 = vmatprep.mubr.msk.bf16.mxu0 %vm4777_vm0, %v4776_v63 }
 0xda5   : > { %2023 = vmatprep.subr.bf16.mxu0 %v4356_v24 }
 0xe76   : > { %v1914_v58 = vpop.f32.mrb[32].mxu0 }
 0xe77   : > { %v1921_v59 = vmul.f32 0.125, %v1914_v58  ;;  %v4067_v60 = vpop.f32.mrb[33].mxu0 }
 0xe78   : > { %v1917_v62 = vpop.f32.mrb[34].mxu0 }
 0xe79   : > { %v1922_v0 = vmul.f32 0.125, %v1917_v62  ;;  %v4068_v1 = vpop.f32.mrb[35].mxu0  ;;  %v1923_v2 = vsel %vm748_vm3, %v1921_v59, -inf }
 0xe7a   : > { %1924 = vmax.xlane.f32.xlu0 %v1923_v2 }
 0xe7b   : > { %v1926_v3 = vsel %vm748_vm3, %v1922_v0, -inf }
 0xe7c   : > { %1927 = vmax.xlane.f32.xlu1 %v1926_v3 }
 0xf07   : > { %v1925_v4 = vpop.xlane.xlu0 %1924 }
 0xf08   : > { %v1929_v5 = vsub.f32 %v1921_v59, %v1925_v4 }
 0xf09   : > { %v1928_v6 = vpop.xlane.xlu1 %1927 }
 0xf0a   : > { %v1931_v11 = vmul.f32 1.442695, %v1929_v5  ;;  %v1930_v13 = vsub.f32 %v1922_v0, %v1928_v6  ;;  %v4368_v6 = vld [vmem:[#allocation7 + $0xa4] ss:$8 sps:$4 sm:$0xff]  }
 0xf0b   : > { %2489 = vmatprep.subr.bf16.mxu1 %v4368_v6 }
 0xf0c   : > { %4470 = vpow2.f32 %v1931_v11  ;;  %v1933_v17 = vmul.f32 1.442695, %v1930_v13  ;;  %v4390_v11 = vld [vmem:[#allocation11 + $0x80] ss:$8 sps:$4 sm:$0xff]   ;;  %v4392_v13 = vld [vmem:[#allocation11 + $0x84] ss:$8 sps:$4 sm:$0xff]  }
 0xf0e   : > { %4472 = vpow2.f32 %v1933_v17  ;;  %v4395_v17 = vld [vmem:[#allocation11 + $0x94] ss:$8 sps:$4 sm:$0xff]  }
 0xf16   : > { %v4471_v19 = vpop.eup %4470 }
 0xf17   : > { %v1935_v20 = vsel %vm748_vm3, %v4471_v19, 0.0 }
 0xf18   : > { %v4473_v22 = vpop.eup %4472  ;;  %1936 = vadd.xlane.f32.xlu0 %v1935_v20 }
 0xf19   : > { %v1938_v23 = vsel %vm748_vm3, %v4473_v22, 0.0 }
 0xf1a   : > { %1939 = vadd.xlane.f32.xlu1 %v1938_v23 }
 0xfa5   : > { %v1937_v25 = vpop.xlane.xlu0 %1936 }
 0xfa6   : > { %4474 = vrcp.f32 %v1937_v25 }
 0xfa7   : > { %v1940_v26 = vpop.xlane.xlu1 %1939 }
 0xfa8   : > { %4476 = vrcp.f32 %v1940_v26 }
 0xfb0   : > { %v4475_v18 = vpop.eup %4474 }
 0xfb1   : > { %v1943_v28 = vmul.f32 %v4475_v18, %v4471_v19  ;;  %v4393_v19 = vld [vmem:[#allocation11 + $0x90] ss:$8 sps:$4 sm:$0xff]   ;;  %v4366_v18 = vld [vmem:[#allocation7 + $0xa0] ss:$8 sps:$4 sm:$0xff]  }
 0xfb2   : > { %v4477_v27 = vpop.eup %4476 }
 0xfb3   : > { %v1944_v29 = vmul.f32 %v4477_v27, %v4473_v22 }
 0xfb5   : > { %v1945_v12 = vpack.c.bf16 %v1944_v29, %v1943_v28  ;;  %v4371_v28 = vld [vmem:[#allocation7 + $0xb4] ss:$8 sps:$4 sm:$0xff]   ;;  %v4369_v29 = vld [vmem:[#allocation7 + $0xb0] ss:$8 sps:$4 sm:$0xff]  }
 0xfb7   : > { %4072 = vmatmul.mubr.msk.bf16.vlgmr.msra.gmra.mrb[36].mxu0 %vm748_vm3, %v1945_v12  ;;  %v4372_v12 = vld [vmem:[#allocation10 + $0xa0] ss:$8 sps:$4 sm:$0xff]  }
 0xfb8   : > { %2024 = vmatpush1.bf16.msra.mxu0 %v4354_v30  ;;  %2055 = vmatprep.mubr.bf16.mxu0 %v4778_v61  ;;  %v4374_v30 = vld [vmem:[#allocation10 + $0xa4] ss:$8 sps:$4 sm:$0xff]  }
 0xfb9   : > { %2025 = vmatprep.subr.bf16.mxu0 %v4359_v14  ;;  %v4377_v14 = vld [vmem:[#allocation10 + $0xb4] ss:$8 sps:$4 sm:$0xff]  }
 0xfbc   : > { %2026 = vmatpush1.bf16.msra.mxu0 %v4357_v15  ;;  %v4375_v15 = vld [vmem:[#allocation10 + $0xb0] ss:$8 sps:$4 sm:$0xff]  }
 0xfbd   : > { %2161 = vmatprep.subr.bf16.mxu0 %v4362_v31  ;;  %v4380_v31 = vld [vmem:[#allocation7 + $0xc4] ss:$8 sps:$4 sm:$0xff]  }
0x108a   : > { %v1987_v32 = vpop.f32.mrb[36].mxu0 }
0x108b   : > { %v4073_v33 = vpop.f32.mrb[37].mxu0 }
0x108c   : > { %v1990_v36 = vpop.f32.mrb[38].mxu0  ;;  %v4383_v33 = vld [vmem:[#allocation7 + $0xd4] ss:$8 sps:$4 sm:$0xff]  }
0x108d   : > { %v1994_v41 = vpack.c.bf16 %v1990_v36, %v1987_v32  ;;  %v4074_v42 = vpop.f32.mrb[39].mxu0  ;;  %v4378_v32 = vld [vmem:[#allocation7 + $0xc0] ss:$8 sps:$4 sm:$0xff]   ;;  %v4381_v36 = vld [vmem:[#allocation7 + $0xd0] ss:$8 sps:$4 sm:$0xff]  }
0x108e   : > { %v4389_v42 = vld [vmem:[#allocation10 + $0xd4] ss:$8 sps:$4 sm:$0xff]  }
0x108f   : > { %3910 = vmatmul.mubr.msk.bf16.vlgmr.msra.gmra.mrb[16].mxu0 %vm698_vm1, %v1994_v41  ;;  %v4384_v41 = vld [vmem:[#allocation10 + $0xc0] ss:$8 sps:$4 sm:$0xff]  }
0x1090   : > { %2162 = vmatpush1.bf16.xpose.msra.mxu0 %v4360_v38  ;;  %2193 = vmatprep.mubr.bf16.mxu0 %v5160_v50  ;;  %v4386_v38 = vld [vmem:[#allocation10 + $0xc4] ss:$8 sps:$4 sm:$0xff]  }
0x1091   : > { %2163 = vmatprep.subr.bf16.mxu0 %v4365_v43  ;;  %v4387_v43 = vld [vmem:[#allocation10 + $0xd0] ss:$8 sps:$4 sm:$0xff]  }
0x1098   : > { %2164 = vmatpush1.bf16.xpose.msra.mxu0 %v4363_v44  ;;  %v4398_v44 = vld [vmem:[#allocation8 + $0xa4] ss:$8 sps:$4 sm:$0xff]  }
0x1099   : > { %4075 = vmatprep.subr.bf16.mxu0 %v4776_v63 }
0x109f   : > { %2194 = vmatmul.mubr.bf16.vlgmr.msra.gmra.mrb[40].mxu0 %v5158_v49 }
0x10a0   : > { %4077 = vmatprep.mubr.msk.bf16.mxu0 %vm4777_vm0, %v4776_v63 }
0x1172   : > { %v2195_v45 = vpop.f32.mrb[40].mxu0 }
0x1173   : > { %v2267_v46 = vpack.c.bf16 %v2195_v45, %v2195_v45  ;;  %v2197_v47 = vpop.f32.mrb[41].mxu0 }
0x1174   : > { %v2198_v48 = vpop.f32.mrb[42].mxu0 }
0x1175   : > { %v2272_v51 = vsel %vm698_vm1, %v2267_v46, 0  ;;  %v2199_v52 = vpop.f32.mrb[43].mxu0  ;;  %v4396_v48 = vld [vmem:[#allocation8 + $0xa0] ss:$8 sps:$4 sm:$0xff]  }
0x1176   : > { %4076 = vmatpush3.bf16.xpose.msra.mxu0 %v2272_v51 }
0x1177   : > { %2417 = vmatprep.subr.bf16.mxu0 %v4392_v13 }
0x117d   : > { %4078 = vmatmul.mubr.msk.bf16.vlgmr.msra.gmra.mrb[44].mxu0 %vm698_vm1, %v2266_v40 }
0x117e   : > { %2449 = vmatprep.mubr.bf16.mxu0 %v4778_v61  ;;  %2418 = vmatpush1.bf16.msra.mxu0 %v4390_v11 }
0x117f   : > { %2419 = vmatprep.subr.bf16.mxu0 %v4395_v17 }
0x1182   : > { %2420 = vmatpush1.bf16.msra.mxu0 %v4393_v19 }
0x1183   : > { %2555 = vmatprep.subr.bf16.mxu0 %v4398_v44 }
0x1250   : > { %v2308_v53 = vpop.f32.mrb[44].mxu0 }
0x1251   : > { %v2315_v54 = vmul.f32 0.125, %v2308_v53  ;;  %v4079_v55 = vpop.f32.mrb[45].mxu0  ;;  %v4401_v53 = vld [vmem:[#allocation8 + $0xb4] ss:$8 sps:$4 sm:$0xff]  }
0x1252   : > { %v2311_v56 = vpop.f32.mrb[46].mxu0 }
0x1253   : > { %v2316_v57 = vmul.f32 0.125, %v2311_v56  ;;  %v4080_v58 = vpop.f32.mrb[47].mxu0  ;;  %v2317_v59 = vsel %vm748_vm3, %v2315_v54, -inf }
0x1254   : > { %2318 = vmax.xlane.f32.xlu0 %v2317_v59 }
0x1255   : > { %v2320_v60 = vsel %vm748_vm3, %v2316_v57, -inf }
0x1256   : > { %2321 = vmax.xlane.f32.xlu1 %v2320_v60 }
0x12e1   : > { %v2319_v62 = vpop.xlane.xlu0 %2318 }
0x12e2   : > { %v2323_v0 = vsub.f32 %v2315_v54, %v2319_v62  ;;  %v4399_v54 = vld [vmem:[#allocation8 + $0xb0] ss:$8 sps:$4 sm:$0xff]  }
0x12e3   : > { %v2322_v1 = vpop.xlane.xlu1 %2321 }
0x12e4   : > { %v2325_v37 = vmul.f32 1.442695, %v2323_v0  ;;  %v2324_v39 = vsub.f32 %v2316_v57, %v2322_v1 }
0x12e6   : > { %4478 = vpow2.f32 %v2325_v37  ;;  %v2327_v40 = vmul.f32 1.442695, %v2324_v39 }
0x12e8   : > { %4480 = vpow2.f32 %v2327_v40 }
0x12f0   : > { %v4479_v2 = vpop.eup %4478 }
0x12f1   : > { %v2329_v3 = vsel %vm748_vm3, %v4479_v2, 0.0 }
0x12f2   : > { %v4481_v4 = vpop.eup %4480  ;;  %2330 = vadd.xlane.f32.xlu0 %v2329_v3 }
0x12f3   : > { %v2332_v5 = vsel %vm748_vm3, %v4481_v4, 0.0 }
0x12f4   : > { %2333 = vadd.xlane.f32.xlu1 %v2332_v5 }
0x137f   : > { %v2331_v20 = vpop.xlane.xlu0 %2330 }
0x1380   : > { %4482 = vrcp.f32 %v2331_v20 }
0x1381   : > { %v2334_v22 = vpop.xlane.xlu1 %2333 }
0x1382   : > { %4484 = vrcp.f32 %v2334_v22 }
0x138a   : > { %v4483_v23 = vpop.eup %4482 }
0x138b   : > { %v2337_v25 = vmul.f32 %v4483_v23, %v4479_v2 }
0x138c   : > { %v4485_v24 = vpop.eup %4484 }
0x138d   : > { %v2338_v26 = vmul.f32 %v4485_v24, %v4481_v4 }
0x138f   : > { %v2339_v27 = vpack.c.bf16 %v2338_v26, %v2337_v25 }
0x1391   : > { %4084 = vmatmul.mubr.msk.bf16.vlgmr.msra.gmra.mrb[56].mxu1 %vm748_vm3, %v2339_v27 }
0x1392   : > { %2490 = vmatpush1.bf16.xpose.msra.mxu1 %v4366_v18  ;;  %2521 = vmatprep.mubr.bf16.mxu1 %v5136_v16 }
0x1393   : > { %2491 = vmatprep.subr.bf16.mxu1 %v4371_v28 }
0x139a   : > { %2492 = vmatpush1.bf16.xpose.msra.mxu1 %v4369_v29 }
0x139b   : > { %2620 = vmatprep.subr.bf16.mxu1 %v4374_v30 }
0x13a1   : > { %2522 = vmatmul.mubr.bf16.vlgmr.msra.gmra.mrb[60].mxu1 %v5140_v21 }
0x13a2   : > { %2621 = vmatpush1.bf16.xpose.msra.mxu1 %v4372_v12  ;;  %2652 = vmatprep.mubr.bf16.mxu1 %v5160_v50 }
0x13a3   : > { %2622 = vmatprep.subr.bf16.mxu1 %v4377_v14 }
0x13aa   : > { %2623 = vmatpush1.bf16.xpose.msra.mxu1 %v4375_v15 }
0x13ab   : > { %2883 = vmatprep.subr.bf16.mxu1 %v4380_v31 }
0x13b1   : > { %2653 = vmatmul.mubr.bf16.vlgmr.msra.gmra.mrb[64].mxu1 %v5158_v49 }
0x13b2   : > { %2884 = vmatpush1.bf16.xpose.msra.mxu1 %v4378_v32  ;;  %2915 = vmatprep.mubr.bf16.mxu1 %v5136_v16 }
0x13b3   : > { %2885 = vmatprep.subr.bf16.mxu1 %v4383_v33 }
0x13ba   : > { %2886 = vmatpush1.bf16.xpose.msra.mxu1 %v4381_v36 }
0x13bb   : > { %3014 = vmatprep.subr.bf16.mxu1 %v4386_v38 }
0x13c1   : > { %2916 = vmatmul.mubr.bf16.vlgmr.msra.gmra.mrb[68].mxu1 %v5140_v21 }
0x13c2   : > { %3015 = vmatpush1.bf16.xpose.msra.mxu1 %v4384_v41  ;;  %3046 = vmatprep.mubr.bf16.mxu1 %v5160_v50 }
0x13c3   : > { %3016 = vmatprep.subr.bf16.mxu1 %v4389_v42 }
0x13ca   : > { %3017 = vmatpush1.bf16.xpose.msra.mxu1 %v4387_v43 }
0x13cb   : > { %4105 = vmatprep.subr.bf16.mxu1 %v4776_v63 }
0x13d1   : > { %3047 = vmatmul.mubr.bf16.vlgmr.msra.gmra.mrb[72].mxu1 %v5158_v49 }
0x13d2   : > { %4107 = vmatprep.mubr.msk.bf16.mxu1 %vm4777_vm0, %v4776_v63 }
0x1464   : > { %v2381_v45 = vpop.f32.mrb[56].mxu1 }
0x1465   : > { %v4085_v46 = vpop.f32.mrb[57].mxu1 }
0x1466   : > { %v2384_v47 = vpop.f32.mrb[58].mxu1 }
0x1467   : > { %v2388_v51 = vpack.c.bf16 %v2384_v47, %v2381_v45  ;;  %v4086_v52 = vpop.f32.mrb[59].mxu1  ;;  %v4404_v47 = vld [vmem:[#allocation11 + $0xa4] ss:$8 sps:$4 sm:$0xff]  }
0x1469   : > { %3929 = vmatmul.mubr.msk.bf16.vlgmr.msra.gmra.mrb[16].mxu0 %vm698_vm1, %v2388_v51 }
0x146a   : > { %2556 = vmatpush1.bf16.xpose.msra.mxu0 %v4396_v48  ;;  %2587 = vmatprep.mubr.bf16.mxu0 %v5160_v50 }
0x146b   : > { %2557 = vmatprep.subr.bf16.mxu0 %v4401_v53 }
0x1472   : > { %2558 = vmatpush1.bf16.xpose.msra.mxu0 %v4399_v54 }
0x1473   : > { %4087 = vmatprep.subr.bf16.mxu0 %v4776_v63 }
0x1474   : > { %v2523_v55 = vpop.f32.mrb[60].mxu1 }
0x1475   : > { %v2525_v56 = vpop.f32.mrb[61].mxu1 }
0x1476   : > { %v2526_v57 = vpop.f32.mrb[62].mxu1  ;;  %v4402_v56 = vld [vmem:[#allocation11 + $0xa0] ss:$8 sps:$4 sm:$0xff]  }
0x1477   : > { %v2660_v58 = vpack.c.bf16 %v2526_v57, %v2523_v55  ;;  %v2528_v59 = vpop.f32.mrb[63].mxu1 }
0x1478   : > { %v4405_v59 = vld [vmem:[#allocation11 + $0xb0] ss:$8 sps:$4 sm:$0xff]  }
0x1479   : > { %2588 = vmatmul.mubr.bf16.vlgmr.msra.gmra.mrb[48].mxu0 %v5158_v49 }
0x147a   : > { %4089 = vmatprep.mubr.msk.bf16.mxu0 %vm4777_vm0, %v4776_v63 }
0x1484   : > { %v2654_v60 = vpop.f32.mrb[64].mxu1 }
0x1485   : > { %v2656_v62 = vpop.f32.mrb[65].mxu1  ;;  %v2734_v26 = vpack.c.bf16 %v2654_v60, %v2654_v60  ;;  %v4410_v60 = vld [vmem:[#allocation8 + $0xc4] ss:$8 sps:$4 sm:$0xff]  }
0x1486   : > { %v2657_v0 = vpop.f32.mrb[66].mxu1 }
0x1487   : > { %v2658_v1 = vpop.f32.mrb[67].mxu1  ;;  %v2739_v18 = vsel %vm776_vm2, %v2734_v26, 0 }
0x1494   : > { %v5316_v37 = vpop.f32.mrb[68].mxu1 }
0x1495   : > { %v2919_v39 = vpop.f32.mrb[69].mxu1 }
0x1496   : > { %v5318_v40 = vpop.f32.mrb[70].mxu1  ;;  %v4408_v39 = vld [vmem:[#allocation8 + $0xc0] ss:$8 sps:$4 sm:$0xff]  }
0x1497   : > { %v3054_v2 = vpack.c.bf16 %v5318_v40, %v5316_v37  ;;  %v2922_v3 = vpop.f32.mrb[71].mxu1 }
0x14a4   : > { %v3048_v4 = vpop.f32.mrb[72].mxu1 }
0x14a5   : > { %v3128_v5 = vpack.c.bf16 %v3048_v4, %v3048_v4  ;;  %v3050_v6 = vpop.f32.mrb[73].mxu1 }
0x14a6   : > { %v3051_v11 = vpop.f32.mrb[74].mxu1  ;;  %v4411_v6 = vld [vmem:[#allocation8 + $0xd0] ss:$8 sps:$4 sm:$0xff]  }
0x14a7   : > { %v3133_v13 = vsel %vm776_vm2, %v3128_v5, 0  ;;  %v3052_v17 = vpop.f32.mrb[75].mxu1  ;;  %v4413_v5 = vld [vmem:[#allocation8 + $0xd4] ss:$8 sps:$4 sm:$0xff]  }
0x14a8   : > { %4106 = vmatpush3.bf16.msra.mxu1 %v3133_v13 }
0x154c   : > { %v2589_v19 = vpop.f32.mrb[48].mxu0 }
0x154d   : > { %v2661_v20 = vpack.c.bf16 %v2589_v19, %v2589_v19  ;;  %v2591_v22 = vpop.f32.mrb[49].mxu0 }
0x154e   : > { %v2592_v23 = vpop.f32.mrb[50].mxu0 }
0x154f   : > { %v2666_v24 = vsel %vm698_vm1, %v2661_v20, 0  ;;  %v2593_v25 = vpop.f32.mrb[51].mxu0 }
0x1550   : > { %4088 = vmatpush3.bf16.xpose.msra.mxu0 %v2666_v24 }
0x1551   : > { %4093 = vmatprep.subr.bf16.mxu0 %v4776_v63 }
0x1557   : > { %4090 = vmatmul.mubr.msk.bf16.vlgmr.msra.gmra.mrb[52].mxu0 %vm698_vm1, %v2660_v58  ;;  %v4407_v58 = vld [vmem:[#allocation11 + $0xb4] ss:$8 sps:$4 sm:$0xff]  }
0x1558   : > { %4094 = vmatpush3.bf16.msra.mxu0 %v2739_v18  ;;  %4095 = vmatprep.mubr.msk.bf16.mxu0 %vm4777_vm0, %v4776_v63 }
0x1559   : > { %2811 = vmatprep.subr.bf16.mxu0 %v4404_v47 }
0x162a   : > { %v2702_v27 = vpop.f32.mrb[52].mxu0 }
0x162b   : > { %v2709_v28 = vmul.f32 0.125, %v2702_v27  ;;  %v4091_v29 = vpop.f32.mrb[53].mxu0 }
0x162c   : > { %v2705_v30 = vpop.f32.mrb[54].mxu0 }
0x162d   : > { %v2710_v12 = vmul.f32 0.125, %v2705_v30  ;;  %v4092_v14 = vpop.f32.mrb[55].mxu0  ;;  %v2711_v15 = vsel %vm748_vm3, %v2709_v28, -inf }
0x162e   : > { %2712 = vmax.xlane.f32.xlu0 %v2711_v15 }
0x162f   : > { %v2714_v31 = vsel %vm748_vm3, %v2710_v12, -inf }
0x1630   : > { %2715 = vmax.xlane.f32.xlu1 %v2714_v31 }
0x16bb   : > { %v2713_v32 = vpop.xlane.xlu0 %2712 }
0x16bc   : > { %v2717_v33 = vsub.f32 %v2709_v28, %v2713_v32 }
0x16bd   : > { %v2716_v36 = vpop.xlane.xlu1 %2715 }
0x16be   : > { %v2719_v38 = vmul.f32 1.442695, %v2717_v33  ;;  %v2718_v41 = vsub.f32 %v2710_v12, %v2716_v36  ;;  %v4416_v36 = vld [vmem:[#allocation7 + $0xe4] ss:$8 sps:$4 sm:$0xff]  }
0x16bf   : > { %3277 = vmatprep.subr.bf16.mxu1 %v4416_v36 }
0x16c0   : > { %4486 = vpow2.f32 %v2719_v38  ;;  %v2721_v42 = vmul.f32 1.442695, %v2718_v41  ;;  %v4426_v38 = vld [vmem:[#allocation11 + $0xc0] ss:$8 sps:$4 sm:$0xff]   ;;  %v4428_v41 = vld [vmem:[#allocation11 + $0xc4] ss:$8 sps:$4 sm:$0xff]  }
0x16c2   : > { %4488 = vpow2.f32 %v2721_v42  ;;  %v4431_v42 = vld [vmem:[#allocation11 + $0xd4] ss:$8 sps:$4 sm:$0xff]  }
0x16ca   : > { %v4487_v43 = vpop.eup %4486 }
0x16cb   : > { %v2723_v44 = vsel %vm748_vm3, %v4487_v43, 0.0 }
0x16cc   : > { %v4489_v45 = vpop.eup %4488  ;;  %2724 = vadd.xlane.f32.xlu0 %v2723_v44 }
0x16cd   : > { %v2726_v46 = vsel %vm748_vm3, %v4489_v45, 0.0 }
0x16ce   : > { %2727 = vadd.xlane.f32.xlu1 %v2726_v46 }
0x1759   : > { %v2725_v48 = vpop.xlane.xlu0 %2724 }
0x175a   : > { %4490 = vrcp.f32 %v2725_v48 }
0x175b   : > { %v2728_v51 = vpop.xlane.xlu1 %2727 }
0x175c   : > { %4492 = vrcp.f32 %v2728_v51 }
0x1764   : > { %v4491_v52 = vpop.eup %4490 }
0x1765   : > { %v2731_v54 = vmul.f32 %v4491_v52, %v4487_v43  ;;  %v4429_v43 = vld [vmem:[#allocation11 + $0xd0] ss:$8 sps:$4 sm:$0xff]   ;;  %v4414_v52 = vld [vmem:[#allocation7 + $0xe0] ss:$8 sps:$4 sm:$0xff]  }
0x1766   : > { %v4493_v53 = vpop.eup %4492 }
0x1767   : > { %v2732_v55 = vmul.f32 %v4493_v53, %v4489_v45 }
0x1769   : > { %v2733_v57 = vpack.c.bf16 %v2732_v55, %v2731_v54  ;;  %v4419_v54 = vld [vmem:[#allocation7 + $0xf4] ss:$8 sps:$4 sm:$0xff]   ;;  %v4417_v55 = vld [vmem:[#allocation7 + $0xf0] ss:$8 sps:$4 sm:$0xff]  }
0x176b   : > { %4096 = vmatmul.mubr.msk.bf16.vlgmr.msra.gmra.mrb[56].mxu0 %vm748_vm3, %v2733_v57  ;;  %v4420_v57 = vld [vmem:[#allocation10 + $0xe0] ss:$8 sps:$4 sm:$0xff]  }
0x176c   : > { %2812 = vmatpush1.bf16.msra.mxu0 %v4402_v56  ;;  %2843 = vmatprep.mubr.bf16.mxu0 %v4778_v61  ;;  %v4422_v56 = vld [vmem:[#allocation10 + $0xe4] ss:$8 sps:$4 sm:$0xff]  }
0x176d   : > { %2813 = vmatprep.subr.bf16.mxu0 %v4407_v58  ;;  %v4425_v58 = vld [vmem:[#allocation10 + $0xf4] ss:$8 sps:$4 sm:$0xff]  }
0x1770   : > { %2814 = vmatpush1.bf16.msra.mxu0 %v4405_v59  ;;  %v4423_v59 = vld [vmem:[#allocation10 + $0xf0] ss:$8 sps:$4 sm:$0xff]  }
0x1771   : > { %2949 = vmatprep.subr.bf16.mxu0 %v4410_v60  ;;  %v4434_v60 = vld [vmem:[#allocation8 + $0xe4] ss:$8 sps:$4 sm:$0xff]  }
0x183e   : > { %v2775_v62 = vpop.f32.mrb[56].mxu0 }
0x183f   : > { %v4097_v0 = vpop.f32.mrb[57].mxu0 }
0x1840   : > { %v2778_v1 = vpop.f32.mrb[58].mxu0 }
0x1841   : > { %v2782_v3 = vpack.c.bf16 %v2778_v1, %v2775_v62  ;;  %v4098_v4 = vpop.f32.mrb[59].mxu0  ;;  %v4432_v1 = vld [vmem:[#allocation8 + $0xe0] ss:$8 sps:$4 sm:$0xff]  }
0x1842   : > { %v4437_v4 = vld [vmem:[#allocation8 + $0xf4] ss:$8 sps:$4 sm:$0xff]  }
0x1843   : > { %3948 = vmatmul.mubr.msk.bf16.vlgmr.msra.gmra.mrb[16].mxu0 %vm698_vm1, %v2782_v3 }
0x1844   : > { %2950 = vmatpush1.bf16.xpose.msra.mxu0 %v4408_v39  ;;  %2981 = vmatprep.mubr.bf16.mxu0 %v5160_v50 }
0x1845   : > { %2951 = vmatprep.subr.bf16.mxu0 %v4413_v5 }
0x184c   : > { %2952 = vmatpush1.bf16.xpose.msra.mxu0 %v4411_v6 }
0x184d   : > { %4099 = vmatprep.subr.bf16.mxu0 %v4776_v63 }
0x1853   : > { %2982 = vmatmul.mubr.bf16.vlgmr.msra.gmra.mrb[60].mxu0 %v5158_v49 }
0x1854   : > { %4101 = vmatprep.mubr.msk.bf16.mxu0 %vm4777_vm0, %v4776_v63 }
0x1926   : > { %v2983_v11 = vpop.f32.mrb[60].mxu0 }
0x1927   : > { %v3055_v13 = vpack.c.bf16 %v2983_v11, %v2983_v11  ;;  %v2985_v17 = vpop.f32.mrb[61].mxu0 }
0x1928   : > { %v2986_v19 = vpop.f32.mrb[62].mxu0 }
0x1929   : > { %v3060_v20 = vsel %vm698_vm1, %v3055_v13, 0  ;;  %v2987_v22 = vpop.f32.mrb[63].mxu0 }
0x192a   : > { %4100 = vmatpush3.bf16.xpose.msra.mxu0 %v3060_v20 }
0x192b   : > { %3205 = vmatprep.subr.bf16.mxu0 %v4428_v41 }
0x1931   : > { %4102 = vmatmul.mubr.msk.bf16.vlgmr.msra.gmra.mrb[64].mxu0 %vm698_vm1, %v3054_v2 }
0x1932   : > { %3237 = vmatprep.mubr.bf16.mxu0 %v4778_v61  ;;  %3206 = vmatpush1.bf16.msra.mxu0 %v4426_v38 }
0x1933   : > { %3207 = vmatprep.subr.bf16.mxu0 %v4431_v42 }
0x1936   : > { %3208 = vmatpush1.bf16.msra.mxu0 %v4429_v43 }
0x1937   : > { %3343 = vmatprep.subr.bf16.mxu0 %v4434_v60 }
0x1a04   : > { %v3096_v23 = vpop.f32.mrb[64].mxu0 }
0x1a05   : > { %v3103_v24 = vmul.f32 0.125, %v3096_v23  ;;  %v4103_v25 = vpop.f32.mrb[65].mxu0 }
0x1a06   : > { %v3099_v26 = vpop.f32.mrb[66].mxu0 }
0x1a07   : > { %v3104_v18 = vmul.f32 0.125, %v3099_v26  ;;  %v4104_v27 = vpop.f32.mrb[67].mxu0  ;;  %v3105_v28 = vsel %vm748_vm3, %v3103_v24, -inf }
0x1a08   : > { %3106 = vmax.xlane.f32.xlu0 %v3105_v28 }
0x1a09   : > { %v3108_v29 = vsel %vm748_vm3, %v3104_v18, -inf }
0x1a0a   : > { %3109 = vmax.xlane.f32.xlu1 %v3108_v29 }
0x1a95   : > { %v3107_v30 = vpop.xlane.xlu0 %3106 }
0x1a96   : > { %v3111_v12 = vsub.f32 %v3103_v24, %v3107_v30 }
0x1a97   : > { %v3110_v14 = vpop.xlane.xlu1 %3109 }
0x1a98   : > { %v3113_v37 = vmul.f32 1.442695, %v3111_v12  ;;  %v3112_v40 = vsub.f32 %v3104_v18, %v3110_v14 }
0x1a9a   : > { %4494 = vpow2.f32 %v3113_v37  ;;  %v3115_v2 = vmul.f32 1.442695, %v3112_v40 }
0x1a9c   : > { %4496 = vpow2.f32 %v3115_v2 }
0x1aa4   : > { %v4495_v15 = vpop.eup %4494 }
0x1aa5   : > { %v3117_v31 = vsel %vm748_vm3, %v4495_v15, 0.0 }
0x1aa6   : > { %v4497_v32 = vpop.eup %4496  ;;  %3118 = vadd.xlane.f32.xlu0 %v3117_v31 }
0x1aa7   : > { %v3120_v33 = vsel %vm748_vm3, %v4497_v32, 0.0 }
0x1aa8   : > { %3121 = vadd.xlane.f32.xlu1 %v3120_v33 }
0x1b33   : > { %v3119_v44 = vpop.xlane.xlu0 %3118 }
0x1b34   : > { %4498 = vrcp.f32 %v3119_v44 }
0x1b35   : > { %v3122_v45 = vpop.xlane.xlu1 %3121 }
0x1b36   : > { %4500 = vrcp.f32 %v3122_v45  ;;  %v4440_v45 = vld [vmem:[#allocation11 + $0xe4] ss:$8 sps:$4 sm:$0xff]  }
0x1b3e   : > { %v4499_v46 = vpop.eup %4498 }
0x1b3f   : > { %v3125_v48 = vmul.f32 %v4499_v46, %v4495_v15 }
0x1b40   : > { %v4501_v47 = vpop.eup %4500 }
0x1b41   : > { %v3126_v51 = vmul.f32 %v4501_v47, %v4497_v32 }
0x1b43   : > { %v3127_v53 = vpack.c.bf16 %v3126_v51, %v3125_v48 }
0x1b45   : > { %4108 = vmatmul.mubr.msk.bf16.vlgmr.msra.gmra.mrb[76].mxu1 %vm748_vm3, %v3127_v53 }
0x1b46   : > { %3278 = vmatpush1.bf16.xpose.msra.mxu1 %v4414_v52  ;;  %3309 = vmatprep.mubr.bf16.mxu1 %v5136_v16 }
0x1b47   : > { %3279 = vmatprep.subr.bf16.mxu1 %v4419_v54  ;;  %v4438_v54 = vld [vmem:[#allocation11 + $0xe0] ss:$8 sps:$4 sm:$0xff]  }
0x1b4e   : > { %3280 = vmatpush1.bf16.xpose.msra.mxu1 %v4417_v55 }
0x1b4f   : > { %3408 = vmatprep.subr.bf16.mxu1 %v4422_v56  ;;  %v4443_v56 = vld [vmem:[#allocation11 + $0xf4] ss:$8 sps:$4 sm:$0xff]  }
0x1b55   : > { %3310 = vmatmul.mubr.bf16.vlgmr.msra.gmra.mrb[80].mxu1 %v5140_v21  ;;  %v4435_v21 = vld [vmem:[#allocation8 + $0xf0] ss:$8 sps:$4 sm:$0xff]  }
0x1b56   : > { %3409 = vmatpush1.bf16.xpose.msra.mxu1 %v4420_v57  ;;  %3440 = vmatprep.mubr.bf16.mxu1 %v5160_v50  ;;  %v4441_v57 = vld [vmem:[#allocation11 + $0xf0] ss:$8 sps:$4 sm:$0xff]  }
0x1b57   : > { %3410 = vmatprep.subr.bf16.mxu1 %v4425_v58 }
0x1b5e   : > { %3411 = vmatpush1.bf16.xpose.msra.mxu1 %v4423_v59 }
0x1b65   : > { %3441 = vmatmul.mubr.bf16.vlgmr.msra.gmra.mrb[84].mxu1 %v5158_v49 }
0x1c18   : > { %v3169_v16 = vpop.f32.mrb[76].mxu1 }
0x1c19   : > { %v4109_v62 = vpop.f32.mrb[77].mxu1 }
0x1c1a   : > { %v3172_v0 = vpop.f32.mrb[78].mxu1 }
0x1c1b   : > { %v3176_v39 = vpack.c.bf16 %v3172_v0, %v3169_v16  ;;  %v4110_v3 = vpop.f32.mrb[79].mxu1  ;;  %v3646_v0 = vld [vmem:[%s5444_s8] sm:$0x3] }
0x1c1d   : > { %3967 = vmatmul.mubr.msk.bf16.vlgmr.msra.gmra.mrb[16].mxu0 %vm698_vm1, %v3176_v39  ;;  %v3655_v39 = vrot.slane %v3646_v0, %v5146_v35 }
0x1c1e   : > { %3344 = vmatpush1.bf16.xpose.msra.mxu0 %v4432_v1  ;;  %3375 = vmatprep.mubr.bf16.mxu0 %v5160_v50  ;;  %v3651_v1 = vrot.slane %v3646_v0, %v5144_v34 }
0x1c1f   : > { %3345 = vmatprep.subr.bf16.mxu0 %v4437_v4 }
0x1c26   : > { %3346 = vmatpush1.bf16.xpose.msra.mxu0 %v4435_v21 }
0x1c27   : > { %4111 = vmatprep.subr.bf16.mxu0 %v4776_v63 }
0x1c28   : > { %v3311_v5 = vpop.f32.mrb[80].mxu1 }
0x1c29   : > { %v3313_v6 = vpop.f32.mrb[81].mxu1 }
0x1c2a   : > { %v3314_v11 = vpop.f32.mrb[82].mxu1 }
0x1c2b   : > { %v3448_v13 = vpack.c.bf16 %v3314_v11, %v3311_v5  ;;  %v3316_v17 = vpop.f32.mrb[83].mxu1 }
0x1c2d   : > { %3376 = vmatmul.mubr.bf16.vlgmr.msra.gmra.mrb[68].mxu0 %v5158_v49 }
0x1c2e   : > { %4113 = vmatprep.mubr.msk.bf16.mxu0 %vm4777_vm0, %v4776_v63 }
0x1c38   : > { %v3442_v19 = vpop.f32.mrb[84].mxu1 }
0x1c39   : > { %v3444_v20 = vpop.f32.mrb[85].mxu1  ;;  %v3522_v28 = vpack.c.bf16 %v3442_v19, %v3442_v19 }
0x1c3a   : > { %v3445_v22 = vpop.f32.mrb[86].mxu1 }
0x1c3b   : > { %v3446_v23 = vpop.f32.mrb[87].mxu1  ;;  %v3527_v49 = vsel %vm776_vm2, %v3522_v28, 0 }
0x1d00   : > { %v3377_v50 = vpop.f32.mrb[68].mxu0 }
0x1d01   : > { %v3449_v24 = vpack.c.bf16 %v3377_v50, %v3377_v50  ;;  %v3379_v25 = vpop.f32.mrb[69].mxu0 }
0x1d02   : > { %v3380_v26 = vpop.f32.mrb[70].mxu0 }
0x1d03   : > { %v3454_v18 = vsel %vm698_vm1, %v3449_v24, 0  ;;  %v3381_v27 = vpop.f32.mrb[71].mxu0 }
0x1d04   : > { %4112 = vmatpush3.bf16.xpose.msra.mxu0 %v3454_v18 }
0x1d05   : > { %4117 = vmatprep.subr.bf16.mxu0 %v4776_v63 }
0x1d0b   : > { %4114 = vmatmul.mubr.msk.bf16.vlgmr.msra.gmra.mrb[72].mxu0 %vm698_vm1, %v3448_v13 }
0x1d0c   : > { %4118 = vmatpush3.bf16.msra.mxu0 %v3527_v49  ;;  %4119 = vmatprep.mubr.msk.bf16.mxu0 %vm4777_vm0, %v4776_v63 }
0x1d0d   : > { %3599 = vmatprep.subr.bf16.mxu0 %v4440_v45 }
0x1dde   : > { %v3490_v29 = vpop.f32.mrb[72].mxu0 }
0x1ddf   : > { %v3497_v30 = vmul.f32 0.125, %v3490_v29  ;;  %v4115_v12 = vpop.f32.mrb[73].mxu0 }
0x1de0   : > { %v3493_v14 = vpop.f32.mrb[74].mxu0 }
0x1de1   : > { %v3498_v37 = vmul.f32 0.125, %v3493_v14  ;;  %v4116_v40 = vpop.f32.mrb[75].mxu0  ;;  %v3499_v2 = vsel %vm748_vm3, %v3497_v30, -inf }
0x1de2   : > { %3500 = vmax.xlane.f32.xlu0 %v3499_v2 }
0x1de3   : > { %v3502_v15 = vsel %vm748_vm3, %v3498_v37, -inf }
0x1de4   : > { %3503 = vmax.xlane.f32.xlu1 %v3502_v15 }
0x1e6f   : > { %v3501_v31 = vpop.xlane.xlu0 %3500 }
0x1e70   : > { %v3505_v32 = vsub.f32 %v3497_v30, %v3501_v31 }
0x1e71   : > { %v3504_v33 = vpop.xlane.xlu1 %3503 }
0x1e72   : > { %v3507_v36 = vmul.f32 1.442695, %v3505_v32  ;;  %v3506_v38 = vsub.f32 %v3498_v37, %v3504_v33 }
0x1e74   : > { %4502 = vpow2.f32 %v3507_v36  ;;  %v3509_v41 = vmul.f32 1.442695, %v3506_v38 }
0x1e76   : > { %4504 = vpow2.f32 %v3509_v41 }
0x1e7e   : > { %v4503_v63 = vpop.eup %4502 }
0x1e7f   : > { %v3511_v42 = vsel %vm748_vm3, %v4503_v63, 0.0 }
0x1e80   : > { %v4505_v43 = vpop.eup %4504  ;;  %3512 = vadd.xlane.f32.xlu0 %v3511_v42 }
0x1e81   : > { %v3514_v44 = vsel %vm748_vm3, %v4505_v43, 0.0 }
0x1e82   : > { %3515 = vadd.xlane.f32.xlu1 %v3514_v44 }
0x1f0d   : > { %v3513_v46 = vpop.xlane.xlu0 %3512 }
0x1f0e   : > { %4506 = vrcp.f32 %v3513_v46 }
0x1f0f   : > { %v3516_v47 = vpop.xlane.xlu1 %3515 }
0x1f10   : > { %4508 = vrcp.f32 %v3516_v47 }
0x1f18   : > { %v4507_v48 = vpop.eup %4506 }
0x1f19   : > { %v3519_v52 = vmul.f32 %v4507_v48, %v4503_v63 }
0x1f1a   : > { %v4509_v51 = vpop.eup %4508 }
0x1f1b   : > { %v3520_v53 = vmul.f32 %v4509_v51, %v4505_v43 }
0x1f1d   : > { %v3521_v55 = vpack.c.bf16 %v3520_v53, %v3519_v52 }
0x1f1f   : > { %4120 = vmatmul.mubr.msk.bf16.vlgmr.msra.gmra.mrb[76].mxu0 %vm748_vm3, %v3521_v55 }
0x1f20   : > { %3600 = vmatpush1.bf16.msra.mxu0 %v4438_v54  ;;  %3631 = vmatprep.mubr.bf16.mxu0 %v4778_v61 }
0x1f21   : > { %3601 = vmatprep.subr.bf16.mxu0 %v4443_v56 }
0x1f24   : > { %3602 = vmatpush1.bf16.msra.mxu0 %v4441_v57 }
0x1ff2   : > { %v3563_v58 = vpop.f32.mrb[76].mxu0 }
0x1ff3   : > { %v4121_v59 = vpop.f32.mrb[77].mxu0 }
0x1ff4   : > { %v3566_v60 = vpop.f32.mrb[78].mxu0 }
0x1ff5   : > { %v3570_v16 = vpack.c.bf16 %v3566_v60, %v3563_v58  ;;  %v4122_v62 = vpop.f32.mrb[79].mxu0 }
0x1ff7   : > { %3986 = vmatmul.mubr.msk.bf16.vlgmr.msra.gmra.mrb[16].mxu0 %vm698_vm1, %v3570_v16 }
0x20ca   : > { %v3633_v61 = vpop.f32.mrb[16].mxu0 }
0x20cb   : > { %v4123_v3 = vadd.f32 %v3633_v61, %v5230_v7  ;;  %v3635_v4 = vpop.f32.mrb[17].mxu0 }
0x20cc   : > { %v4124_v21 = vadd.f32 %v3635_v4, %v5232_v8  ;;  %v3637_v5 = vpop.f32.mrb[18].mxu0 }
0x20cd   : > { %v3658_v6 = vadd.f32 %v4123_v3, %v3651_v1  ;;  %v4125_v11 = vadd.f32 %v3637_v5, %v5234_v9  ;;  %v3639_v13 = vpop.f32.mrb[19].mxu0 }
0x20ce   : > { %v3659_v34 = vadd.f32 %v4124_v21, %v3655_v39  ;;  %v4126_v35 = vadd.f32 %v3639_v13, %v5236_v10 }
0x20cf   : > { %3662 = vst [vmem:[%s446_s4] sm:$0xff] %v3658_v6  ;;  %v3660_v7 = vadd.f32 %v4125_v11, %v3651_v1 }
0x20d0   : > { %3663 = vst [vmem:[%s446_s4 + $0x8] sm:$0xff] %v3659_v34  ;;  %v3661_v8 = vadd.f32 %v4126_v35, %v3655_v39 }
0x20d1   : > { %3664 = vst [vmem:[%s446_s4 + $0x10] sm:$0xff] %v3660_v7 }
0x20d2   : > { %3665 = vst [vmem:[%s446_s4 + $0x18] sm:$0xff] %v3661_v8 }
0x20d3   : > { %4695 = shalt.err (!%p4692_p1)
}
0x20d4   : > { %s4696_s21 = scalar_lea.hbm %s5392_s0, 512  ;;  %s4700_s9 = scalar_lea.hbm %s5476_s24, 1024 }
0x20d5   : > { %p4697_p11 = scmp.ne.s32.totalorder %s5392_s0, %s4696_s21  ;;  %p4701_p3 = scmp.lt.u32.totalorder %s5392_s0, %s5476_s24 }
0x20d6   : > { %p4702_p13 = scmp.lt.u32.totalorder %s4700_s9, %s4696_s21  ;;  %p4704_p6 = scmp.lt.u32.totalorder %s4696_s21, %s5392_s0 }
0x20d7   : > { %p4698_p8 = pnand %p4697_p11, %p5477_p2 }
0x20d8   : > { %p4703_p0 = por %p4702_p13, %p4701_p3 }
0x20d9   : > { %p4699_p12 = pneg %p4698_p8 }
0x20da   : > { %p4705_p4 = por %p4704_p6, %p4703_p0 }
0x20dc   : > { %p4706_p10 = pnand %p4705_p4, %p4699_p12 }
0x20de   : > { %4709 = shalt.err (!%p4706_p10)
}
0x20df   : > { %s4780_s5 = smov 256   ;;  %s4781_s14 = smov 16  }
0x20e0   : > { %4171 = dma.vmem_to_hbm [thread:$0]  (%p5477_p2), %s5386_s6, 512, %s5392_s0, %s3667_s15, %s4780_s5, %s4780_s5, %s4781_s14  }
0x20e1 PF: > { %s3695_s19 = sand.u32 1, %s4752_s30   ;;  %p5478_p5 = scmp.ne.s32.totalorder %s5465_s28, 0 }
0x20e2   : > { %p5479_p7 = scmp.ge.s32.totalorder %s4764_s12, 2  ;;  %s3696_s16 = scalar_lea.sflag [#allocation4], %s3695_s19 }
0x20e4   : > { %p4194_p9 = pnand %p5479_p7, %p5478_p5 }
0x20e6   : > { %4747 = dma.done.wait (!%p4194_p9), %s3696_s16, 512  }
0x20e7   : > { %4749 = vsyncadd (!%p4194_p9), %s3696_s16, 4294966784  ;;  %p27_p1 = scmp.ge.s32.totalorder %s4984_s27, 4   ;;  %s5480_s30 = smov %s4756_s10 }
0x20e8   : > { %s5481_s10 = smov %s4760_s11  ;;  %s5482_s11 = smov %s4995_s25 }
0x20e9   : > { %s5483_s12 = smov %s4984_s27  ;;  %29 = sbr.rel (!%p27_p1) target bundleno = 15 (0xf), region = 158 }
0x20f0   :  { %3701 = vsyncpa [#allocation3], 1 }
0x20f1   :  { %3703 = vsyncpa [#allocation3 + $0x1], 1 }
0x20f2   :  { %3704 = vsyncpa [#allocation6], 1 }
0x20f3   :  { %3706 = vsyncpa [#allocation6 + $0x1], 1 }
0x20f4   :  { %3707 = vsyncpa [#allocation9], 1 }
0x20f5   :  { %3708 = vsyncpa [#allocation12], 1 }
0x20f6   :  { %3709 = vsyncpa [#allocation4], 1 }
0x20f7   :  { %3711 = vsyncpa [#allocation4 + $0x1], 1 }

</bundles_post_ra>
